<compile_context>
chip_gen: v5e
topology: v5e:2x2
jax: 0.10.0
libtpu: 0.0.40
codegen_flags: <defaults>
</compile_context>

<pallas_src>
import numpy as np
import jax
import jax.numpy as jnp
from jax import lax
from jax.experimental import pallas as pl
from jax.experimental.pallas import tpu as pltpu

# 'near_sym_a' biorthogonal level-1 analysis filters (Kingsbury 5/7-tap).
# Both are symmetric, so pytorch_wavelets' prep_filt() time reversal is a no-op.
H0O = [v / 20.0 for v in (-1.0, 5.0, 12.0, 5.0, -1.0)]                      # lowpass
H1O = [v / 280.0 for v in (-3.0, 15.0, 73.0, -170.0, 73.0, 15.0, -3.0)]     # highpass
MAGBIAS = 0.01
SQRT2 = float(np.sqrt(2.0))
INV_SQRT2 = float(1.0 / np.sqrt(2.0))


# ----------------------------------------------------------------------------
# Trace-time constants: DTCWT symmetric padding indices and banded FIR matrices.
# ----------------------------------------------------------------------------
def _reflect(x, minx, maxx):
    x = np.asanyarray(x, dtype=np.float64)
    rng = maxx - minx
    rng_by_2 = 2 * rng
    mod = np.fmod(x - minx, rng_by_2)
    normed_mod = np.where(mod < 0, mod + rng_by_2, mod)
    out = np.where(normed_mod >= rng, rng_by_2 - normed_mod, normed_mod) + minx
    return out.astype(np.int64)


def _symm_pad_idx(l, m):
    return _reflect(np.arange(-m, l + m), -0.5, l - 0.5)


def _fir_matrix(L, taps, offset):
    """M (L, L) with (x @ M)[j] == sum_k taps[k] * x[sym_pad3(x)[j + k + offset]]."""
    idx = _symm_pad_idx(L, 3)
    M = np.zeros((L, L), np.float64)
    for j in range(L):
        for k, t in enumerate(taps):
            M[idx[j + k + offset], j] += t
    return M


def _row_filter_bank(W):
    """(W, 2W): lane groups = [lo@even cols | lo@odd | hi@even | hi@odd]."""
    lo = _fir_matrix(W, H0O, 1)
    hi = _fir_matrix(W, H1O, 0)
    bank = np.concatenate([lo[:, 0::2], lo[:, 1::2], hi[:, 0::2], hi[:, 1::2]], axis=1)
    return bank.astype(np.float32)


def _col_filter_bank(H):
    """(2H, H): row groups = [col-lo@even rows | col-lo@odd | col-hi@even | col-hi@odd].

    The 1/sqrt(2) of the q2c quad combination is folded in here (ll is
    compensated with 0.25*sqrt(2) in the kernel).
    """
    lo = _fir_matrix(H, H0O, 1).T       # (out_row, in_row)
    hi = _fir_matrix(H, H1O, 0).T
    bank = np.concatenate([lo[0::2], lo[1::2], hi[0::2], hi[1::2]], axis=0)
    return (bank * INV_SQRT2).astype(np.float32)


def _largest_divisor_leq(n, cap):
    cap = max(1, min(n, cap))
    for d in range(cap, 0, -1):
        if n % d == 0:
            return d
    return 1


def _vmem_capacity_bytes():
    try:
        info = pltpu.get_tpu_info()
        cap = getattr(info, "vmem_capacity_bytes", None)
        if cap:
            return int(cap)
    except Exception:
        pass
    return 64 * 2 ** 20     # conservative default (v7x per-TensorCore VMEM)


# ----------------------------------------------------------------------------
# Fused kernel: filter banks -> polyphase -> q2c -> magnitude -> 1x1 mix (+bias)
#   grid = (N, C // cblk), channel axis is the innermost reduction axis.
#   in : x block (1, cblk, H, W) bf16
#        bw      (W, 2W)  bf16 row filter bank
#        chm     (2H, H)  bf16 column filter bank (1/sqrt2 folded in)
#        A block (cblk, 7, F) f32 reordered mixing weight
#        b       (F, 1) f32 bias
#   out: y block (1, F, Hh*Wh) f32 — resident accumulator across the ci axis.
# ----------------------------------------------------------------------------
def _scat_mix_kernel(x_ref, bw_ref, ch_ref, a_ref, b_ref, o_ref):
    _, cb, H, W = x_ref.shape
    Hh, Wh = H // 2, W // 2
    S = Hh * Wh
    F = o_ref.shape[1]

    # Row (width) FIR on the MXU; symmetric padding, filter offsets and the
    # even/odd column split are folded into the banded matrix.
    x2 = x_ref[...].reshape(cb * H, W)
    lohi = jnp.dot(x2, bw_ref[...], preferred_element_type=jnp.float32)
    lohi = lohi.reshape(cb, H, 2 * W).astype(jnp.bfloat16)   # [lo_e|lo_o|hi_e|hi_o]

    # Column (height) FIR on the MXU, batched over the cblk planes of this step.
    ch = jnp.broadcast_to(ch_ref[...][None, :, :], (cb, 2 * H, H))
    sub = lax.dot_general(ch, lohi,
                          dimension_numbers=(((2,), (1,)), ((0,), (0,))),
                          preferred_element_type=jnp.float32)   # (cb, 4*Hh, 4*Wh)

    def quad(rg_e, rg_o, wg_e, wg_o):
        a = sub[:, rg_e * Hh:(rg_e + 1) * Hh, wg_e * Wh:(wg_e + 1) * Wh]
        b = sub[:, rg_e * Hh:(rg_e + 1) * Hh, wg_o * Wh:(wg_o + 1) * Wh]
        c = sub[:, rg_o * Hh:(rg_o + 1) * Hh, wg_e * Wh:(wg_e + 1) * Wh]
        d = sub[:, rg_o * Hh:(rg_o + 1) * Hh, wg_o * Wh:(wg_o + 1) * Wh]
        return a, b, c, d

    bias2 = MAGBIAS * MAGBIAS

    def mags(abcd):
        a, b, c, d = abcd          # 1/sqrt(2) already folded into the column bank
        m1 = jnp.sqrt((a - d) ** 2 + (b + c) ** 2 + bias2) - MAGBIAS
        m2 = jnp.sqrt((a + d) ** 2 + (b - c) ** 2 + bias2) - MAGBIAS
        return m1, m2

    # ll: row-lowpass (lane groups 0,1), col-lowpass (row groups 0,1).
    a, b, c, d = quad(0, 1, 0, 1)
    ll = (0.25 * SQRT2) * (a + b + c + d)        # == avg_pool2d(ll, 2)
    m15, m165 = mags(quad(2, 3, 0, 1))           # lh -> 15 / 165 deg
    m45, m135 = mags(quad(2, 3, 2, 3))           # hh -> 45 / 135 deg
    m75, m105 = mags(quad(0, 1, 2, 3))           # hl -> 75 / 105 deg

    # z block in (channel-major, band-minor) order, lane-dense over Hh*Wh —
    # matches the reordered mixing weight layout (C, 7, F).
    z = jnp.stack([ll, m15, m45, m75, m105, m135, m165], axis=1)  # (cb,7,Hh,Wh)
    z = z.reshape(cb * 7, S)

    a2 = a_ref[...].reshape(cb * 7, F)
    mix = lax.dot_general(a2, z,
                          dimension_numbers=(((0,), (0,)), ((), ())),
                          preferred_element_type=jnp.float32)      # (F, S)

    @pl.when(pl.program_id(1) == 0)
    def _():
        o_ref[0] = jnp.broadcast_to(b_ref[...], (F, S))            # bias init

    o_ref[0] = o_ref[0] + mix


# ----------------------------------------------------------------------------
# Full forward: InvariantLayerj1(C, F=7C, stride=2, alpha=None, biort='near_sym_a')
# ----------------------------------------------------------------------------
def _forward_impl(x, A, bvec, cblk=None):
    # x: (N, C, H, W); A: (F, 7C) 1x1 mixing weight; bvec: (F,)
    N, C, H, W = x.shape
    # TODO(synk): odd-H/W edge replication, the stride==1 bilinear-upsample path
    # and the alpha != None mixing variants are not exercised by the default
    # config and are not implemented.
    assert H % 2 == 0 and W % 2 == 0, "H and W must be even"
    Hh, Wh = H // 2, W // 2
    S = Hh * Wh
    F_out = A.shape[0]

    # bf16 MXU inputs (f32 accumulation); mix weights / bias / output stay f32.
    xb = x.astype(jnp.bfloat16)
    bw = jnp.asarray(_row_filter_bank(W), dtype=jnp.bfloat16)      # (W, 2W)
    chm = jnp.asarray(_col_filter_bank(H), dtype=jnp.bfloat16)     # (2H, H), /sqrt2
    # A columns are band-major (band*C + c); reorder to (C, 7, F) so the per-step
    # slice over the channel axis is a contiguous full-extent block.
    amix = A.astype(jnp.float32).reshape(F_out, 7, C).transpose(2, 1, 0)
    bcol = bvec.astype(jnp.float32).reshape(F_out, 1)

    # Per-generation VMEM budget: banks + resident (F,S) accumulator are fixed,
    # the rest scales with the number of planes processed per step.
    cap = _vmem_capacity_bytes()
    vmem_limit = int(min(0.75 * cap, 112 * 2 ** 20))
    if cblk is None:
        acc_bytes = 2 * F_out * S * 4
        bank_bytes = 2 * 2 * (W * 2 * W + 2 * H * H)
        fixed = acc_bytes + bank_bytes + 8 * F_out
        per_plane = 76 * H * W + 56 * F_out      # dbl-buffered bf16 x + f32 temps
        budget = max(per_plane, int(0.35 * cap) - fixed)
        cblk = _largest_divisor_leq(C, max(1, budget // per_plane))
    else:
        assert C % cblk == 0, "cblk must divide C"

    ymat = pl.pallas_call(
        _scat_mix_kernel,
        out_shape=jax.ShapeDtypeStruct((N, F_out, S), jnp.float32),
        grid=(N, C // cblk),
        in_specs=[
            pl.BlockSpec((1, cblk, H, W), lambda ni, ci: (ni, ci, 0, 0)),
            pl.BlockSpec((W, 2 * W), lambda ni, ci: (0, 0)),
            pl.BlockSpec((2 * H, H), lambda ni, ci: (0, 0)),
            pl.BlockSpec((cblk, 7, F_out), lambda ni, ci: (ci, 0, 0)),
            pl.BlockSpec((F_out, 1), lambda ni, ci: (0, 0)),
        ],
        out_specs=pl.BlockSpec((1, F_out, S), lambda ni, ci: (ni, 0, 0)),
        compiler_params=pltpu.CompilerParams(
            dimension_semantics=("parallel", "arbitrary"),
            vmem_limit_bytes=vmem_limit),
    )(xb, bw, chm, amix, bcol)

    return ymat.reshape(N, F_out, Hh, Wh)


invariant_layer_j1 = jax.jit(_forward_impl, static_argnames=("cblk",))


# ----------------------------------------------------------------------------
# Pure-JAX float32 reference (same math, no Pallas) for verification.
# ----------------------------------------------------------------------------
def _symm_pad2d(x, m):
    H, W = x.shape[-2], x.shape[-1]
    ridx = jnp.asarray(_symm_pad_idx(H, m))
    cidx = jnp.asarray(_symm_pad_idx(W, m))
    x = jnp.take(x, ridx, axis=-2)
    x = jnp.take(x, cidx, axis=-1)
    return x


def reference_forward(x, A, bvec):
    N, C, H, W = x.shape
    P = N * C
    xp = _symm_pad2d(x.reshape(P, H, W).astype(jnp.float32), 3)
    lo = sum(float(H0O[k]) * xp[:, :, k + 1:k + 1 + W] for k in range(5))
    hi = sum(float(H1O[k]) * xp[:, :, k:k + W] for k in range(7))
    ll = sum(float(H0O[k]) * lo[:, k + 1:k + 1 + H, :] for k in range(5))
    hl = sum(float(H0O[k]) * hi[:, k + 1:k + 1 + H, :] for k in range(5))
    lh = sum(float(H1O[k]) * lo[:, k:k + H, :] for k in range(7))
    hh = sum(float(H1O[k]) * hi[:, k:k + H, :] for k in range(7))

    def q2c(y):
        y = y * INV_SQRT2
        a, b = y[:, 0::2, 0::2], y[:, 0::2, 1::2]
        c, d = y[:, 1::2, 0::2], y[:, 1::2, 1::2]
        return (a - d, b + c), (a + d, b - c)

    (r15, i15), (r165, i165) = q2c(lh)
    (r45, i45), (r135, i135) = q2c(hh)
    (r75, i75), (r105, i105) = q2c(hl)
    ll_ds = 0.25 * (ll[:, 0::2, 0::2] + ll[:, 0::2, 1::2] +
                    ll[:, 1::2, 0::2] + ll[:, 1::2, 1::2])

    def mag(r, i):
        return jnp.sqrt(r * r + i * i + MAGBIAS * MAGBIAS) - MAGBIAS

    bands = jnp.stack([ll_ds, mag(r15, i15), mag(r45, i45), mag(r75, i75),
                       mag(r105, i105), mag(r135, i135), mag(r165, i165)], axis=1)
    Z = bands.reshape(N, C, 7, H // 2, W // 2).transpose(0, 2, 1, 3, 4)
    Z = Z.reshape(N, 7 * C, H // 2, W // 2)
    y = jnp.einsum('nchw,fc->nfhw', Z, A) + bvec[None, :, None, None]
    return y


if __name__ == "__main__":
    key = jax.random.PRNGKey(0)
    kx, ka, kb = jax.random.split(key, 3)
    N, C, H, W = 2, 4, 16, 16
    F_out = 7 * C                      # default F = 7*C

    x = jax.random.normal(kx, (N, C, H, W), jnp.float32)
    # xavier_uniform_(A, gain=1.5) on a (F, 7C, 1, 1) conv weight
    fan_in, fan_out = 7 * C, F_out
    bound = 1.5 * float(np.sqrt(6.0 / (fan_in + fan_out)))
    A = jax.random.uniform(ka, (F_out, 7 * C), jnp.float32, -bound, bound)
    bvec = 0.1 * jax.random.normal(kb, (F_out,), jnp.float32)

    y_ref = jax.block_until_ready(reference_forward(x, A, bvec))

    # (1) default channel blocking (single reduction step per batch element).
    y = jax.block_until_ready(invariant_layer_j1(x, A, bvec))
    assert y.shape == (N, F_out, H // 2, W // 2)
    # Tolerance accounts for bf16 MXU inputs (x / filter banks); reference is f32.
    np.testing.assert_allclose(np.asarray(y), np.asarray(y_ref), rtol=2e-2, atol=2e-2)

    # (2) forced smaller channel block -> exercises the fused in-VMEM
    #     mix accumulation across multiple reduction steps.
    y2 = jax.block_until_ready(invariant_layer_j1(x, A, bvec, cblk=2))
    np.testing.assert_allclose(np.asarray(y2), np.asarray(y_ref), rtol=2e-2, atol=2e-2)

    print("KERNEL_OK")
</pallas_src>

<mosaic_0001>
module attributes {stable_mosaic.version = 11 : i64} {
  func.func @_scat_mix_kernel(%arg0: i32, %arg1: i32, %arg2: memref<1x4x16x16xbf16, #tpu.memory_space<vmem>>, %arg3: memref<16x32xbf16, #tpu.memory_space<vmem>>, %arg4: memref<32x16xbf16, #tpu.memory_space<vmem>>, %arg5: memref<4x7x28xf32, #tpu.memory_space<vmem>>, %arg6: memref<28x1xf32, #tpu.memory_space<vmem>>, %arg7: memref<1x28x64xf32, #tpu.memory_space<vmem>>) attributes {dimension_semantics = [#tpu.dimension_semantics<parallel>, #tpu.dimension_semantics<arbitrary>], iteration_bounds = array<i64: 2, 1>, scalar_prefetch = 0 : i64, scratch_operands = 0 : i64, tpu.core_type = #tpu.core_type<tc>, window_params = [{transform_indices = @transform_0, window_bounds = array<i64: 1, 4, 16, 16>}, {pipeline_mode = #tpu.pipeline_mode<synchronous>, transform_indices = @transform_1, window_bounds = array<i64: 16, 32>}, {pipeline_mode = #tpu.pipeline_mode<synchronous>, transform_indices = @transform_2, window_bounds = array<i64: 32, 16>}, {transform_indices = @transform_3, window_bounds = array<i64: 4, 7, 28>}, {pipeline_mode = #tpu.pipeline_mode<synchronous>, transform_indices = @transform_4, window_bounds = array<i64: 28, 1>}, {transform_indices = @transform_5, window_bounds = array<i64: 1, 28, 64>}]} {
    %c0 = arith.constant 0 : index
    %c0_0 = arith.constant 0 : index
    %c0_1 = arith.constant 0 : index
    %c0_2 = arith.constant 0 : index
    %0 = vector.load %arg2[%c0, %c0_0, %c0_1, %c0_2] : memref<1x4x16x16xbf16, #tpu.memory_space<vmem>>, vector<1x4x16x16xbf16>
    %1 = vector.shape_cast %0 : vector<1x4x16x16xbf16> to vector<64x16xbf16>
    %c0_3 = arith.constant 0 : index
    %c0_4 = arith.constant 0 : index
    %2 = vector.load %arg3[%c0_3, %c0_4] : memref<16x32xbf16, #tpu.memory_space<vmem>>, vector<16x32xbf16>
    %cst = arith.constant dense<0.000000e+00> : vector<64x32xf32>
    %3 = tpu.matmul %1, %2, %cst {dimension_numbers = #tpu.dot_dimension_numbers<[1], [0], [0], [1], [0, 0, 1, 1], [], []>} : vector<64x16xbf16>, vector<16x32xbf16>, vector<64x32xf32> -> vector<64x32xf32>
    %4 = vector.shape_cast %3 : vector<64x32xf32> to vector<4x16x32xf32>
    %5 = arith.truncf %4 : vector<4x16x32xf32> to vector<4x16x32xbf16>
    %c0_5 = arith.constant 0 : index
    %c0_6 = arith.constant 0 : index
    %6 = vector.load %arg4[%c0_5, %c0_6] : memref<32x16xbf16, #tpu.memory_space<vmem>>, vector<32x16xbf16>
    %7 = vector.shape_cast %6 : vector<32x16xbf16> to vector<1x32x16xbf16>
    %8 = vector.shape_cast %7 : vector<1x32x16xbf16> to vector<1x32x16xbf16>
    %9 = vector.broadcast %8 : vector<1x32x16xbf16> to vector<4x32x16xbf16>
    %cst_7 = arith.constant dense<0.000000e+00> : vector<4x32x32xf32>
    %10 = tpu.matmul %9, %5, %cst_7 {dimension_numbers = #tpu.dot_dimension_numbers<[2], [1], [1], [2], [0, 0, 0, 1, 1, 2], [0], [0]>} : vector<4x32x16xbf16>, vector<4x16x32xbf16>, vector<4x32x32xf32> -> vector<4x32x32xf32>
    %11 = vector.extract_strided_slice %10 {offsets = [0, 0, 0], sizes = [4, 8, 8], strides = [1, 1, 1]} : vector<4x32x32xf32> to vector<4x8x8xf32>
    %12 = vector.extract_strided_slice %10 {offsets = [0, 0, 8], sizes = [4, 8, 8], strides = [1, 1, 1]} : vector<4x32x32xf32> to vector<4x8x8xf32>
    %13 = vector.extract_strided_slice %10 {offsets = [0, 8, 0], sizes = [4, 8, 8], strides = [1, 1, 1]} : vector<4x32x32xf32> to vector<4x8x8xf32>
    %14 = vector.extract_strided_slice %10 {offsets = [0, 8, 8], sizes = [4, 8, 8], strides = [1, 1, 1]} : vector<4x32x32xf32> to vector<4x8x8xf32>
    %15 = arith.addf %11, %12 : vector<4x8x8xf32>
    %16 = arith.addf %15, %13 : vector<4x8x8xf32>
    %17 = arith.addf %16, %14 : vector<4x8x8xf32>
    %cst_8 = arith.constant 0.353553385 : f32
    %18 = vector.broadcast %cst_8 : f32 to vector<4x8x8xf32>
    %19 = arith.mulf %18, %17 : vector<4x8x8xf32>
    %20 = vector.extract_strided_slice %10 {offsets = [0, 16, 0], sizes = [4, 8, 8], strides = [1, 1, 1]} : vector<4x32x32xf32> to vector<4x8x8xf32>
    %21 = vector.extract_strided_slice %10 {offsets = [0, 16, 8], sizes = [4, 8, 8], strides = [1, 1, 1]} : vector<4x32x32xf32> to vector<4x8x8xf32>
    %22 = vector.extract_strided_slice %10 {offsets = [0, 24, 0], sizes = [4, 8, 8], strides = [1, 1, 1]} : vector<4x32x32xf32> to vector<4x8x8xf32>
    %23 = vector.extract_strided_slice %10 {offsets = [0, 24, 8], sizes = [4, 8, 8], strides = [1, 1, 1]} : vector<4x32x32xf32> to vector<4x8x8xf32>
    %24 = arith.subf %20, %23 : vector<4x8x8xf32>
    %25 = arith.mulf %24, %24 : vector<4x8x8xf32>
    %26 = arith.addf %21, %22 : vector<4x8x8xf32>
    %27 = arith.mulf %26, %26 : vector<4x8x8xf32>
    %28 = arith.addf %25, %27 : vector<4x8x8xf32>
    %cst_9 = arith.constant 9.99999974E-5 : f32
    %29 = vector.broadcast %cst_9 : f32 to vector<4x8x8xf32>
    %30 = arith.addf %28, %29 : vector<4x8x8xf32>
    %31 = math.sqrt %30 : vector<4x8x8xf32>
    %cst_10 = arith.constant 0.00999999977 : f32
    %32 = vector.broadcast %cst_10 : f32 to vector<4x8x8xf32>
    %33 = arith.subf %31, %32 : vector<4x8x8xf32>
    %34 = arith.addf %20, %23 : vector<4x8x8xf32>
    %35 = arith.mulf %34, %34 : vector<4x8x8xf32>
    %36 = arith.subf %21, %22 : vector<4x8x8xf32>
    %37 = arith.mulf %36, %36 : vector<4x8x8xf32>
    %38 = arith.addf %35, %37 : vector<4x8x8xf32>
    %cst_11 = arith.constant 9.99999974E-5 : f32
    %39 = vector.broadcast %cst_11 : f32 to vector<4x8x8xf32>
    %40 = arith.addf %38, %39 : vector<4x8x8xf32>
    %41 = math.sqrt %40 : vector<4x8x8xf32>
    %cst_12 = arith.constant 0.00999999977 : f32
    %42 = vector.broadcast %cst_12 : f32 to vector<4x8x8xf32>
    %43 = arith.subf %41, %42 : vector<4x8x8xf32>
    %44 = vector.extract_strided_slice %10 {offsets = [0, 16, 16], sizes = [4, 8, 8], strides = [1, 1, 1]} : vector<4x32x32xf32> to vector<4x8x8xf32>
    %45 = vector.extract_strided_slice %10 {offsets = [0, 16, 24], sizes = [4, 8, 8], strides = [1, 1, 1]} : vector<4x32x32xf32> to vector<4x8x8xf32>
    %46 = vector.extract_strided_slice %10 {offsets = [0, 24, 16], sizes = [4, 8, 8], strides = [1, 1, 1]} : vector<4x32x32xf32> to vector<4x8x8xf32>
    %47 = vector.extract_strided_slice %10 {offsets = [0, 24, 24], sizes = [4, 8, 8], strides = [1, 1, 1]} : vector<4x32x32xf32> to vector<4x8x8xf32>
    %48 = arith.subf %44, %47 : vector<4x8x8xf32>
    %49 = arith.mulf %48, %48 : vector<4x8x8xf32>
    %50 = arith.addf %45, %46 : vector<4x8x8xf32>
    %51 = arith.mulf %50, %50 : vector<4x8x8xf32>
    %52 = arith.addf %49, %51 : vector<4x8x8xf32>
    %cst_13 = arith.constant 9.99999974E-5 : f32
    %53 = vector.broadcast %cst_13 : f32 to vector<4x8x8xf32>
    %54 = arith.addf %52, %53 : vector<4x8x8xf32>
    %55 = math.sqrt %54 : vector<4x8x8xf32>
    %cst_14 = arith.constant 0.00999999977 : f32
    %56 = vector.broadcast %cst_14 : f32 to vector<4x8x8xf32>
    %57 = arith.subf %55, %56 : vector<4x8x8xf32>
    %58 = arith.addf %44, %47 : vector<4x8x8xf32>
    %59 = arith.mulf %58, %58 : vector<4x8x8xf32>
    %60 = arith.subf %45, %46 : vector<4x8x8xf32>
    %61 = arith.mulf %60, %60 : vector<4x8x8xf32>
    %62 = arith.addf %59, %61 : vector<4x8x8xf32>
    %cst_15 = arith.constant 9.99999974E-5 : f32
    %63 = vector.broadcast %cst_15 : f32 to vector<4x8x8xf32>
    %64 = arith.addf %62, %63 : vector<4x8x8xf32>
    %65 = math.sqrt %64 : vector<4x8x8xf32>
    %cst_16 = arith.constant 0.00999999977 : f32
    %66 = vector.broadcast %cst_16 : f32 to vector<4x8x8xf32>
    %67 = arith.subf %65, %66 : vector<4x8x8xf32>
    %68 = vector.extract_strided_slice %10 {offsets = [0, 0, 16], sizes = [4, 8, 8], strides = [1, 1, 1]} : vector<4x32x32xf32> to vector<4x8x8xf32>
    %69 = vector.extract_strided_slice %10 {offsets = [0, 0, 24], sizes = [4, 8, 8], strides = [1, 1, 1]} : vector<4x32x32xf32> to vector<4x8x8xf32>
    %70 = vector.extract_strided_slice %10 {offsets = [0, 8, 16], sizes = [4, 8, 8], strides = [1, 1, 1]} : vector<4x32x32xf32> to vector<4x8x8xf32>
    %71 = vector.extract_strided_slice %10 {offsets = [0, 8, 24], sizes = [4, 8, 8], strides = [1, 1, 1]} : vector<4x32x32xf32> to vector<4x8x8xf32>
    %72 = arith.subf %68, %71 : vector<4x8x8xf32>
    %73 = arith.mulf %72, %72 : vector<4x8x8xf32>
    %74 = arith.addf %69, %70 : vector<4x8x8xf32>
    %75 = arith.mulf %74, %74 : vector<4x8x8xf32>
    %76 = arith.addf %73, %75 : vector<4x8x8xf32>
    %cst_17 = arith.constant 9.99999974E-5 : f32
    %77 = vector.broadcast %cst_17 : f32 to vector<4x8x8xf32>
    %78 = arith.addf %76, %77 : vector<4x8x8xf32>
    %79 = math.sqrt %78 : vector<4x8x8xf32>
    %cst_18 = arith.constant 0.00999999977 : f32
    %80 = vector.broadcast %cst_18 : f32 to vector<4x8x8xf32>
    %81 = arith.subf %79, %80 : vector<4x8x8xf32>
    %82 = arith.addf %68, %71 : vector<4x8x8xf32>
    %83 = arith.mulf %82, %82 : vector<4x8x8xf32>
    %84 = arith.subf %69, %70 : vector<4x8x8xf32>
    %85 = arith.mulf %84, %84 : vector<4x8x8xf32>
    %86 = arith.addf %83, %85 : vector<4x8x8xf32>
    %cst_19 = arith.constant 9.99999974E-5 : f32
    %87 = vector.broadcast %cst_19 : f32 to vector<4x8x8xf32>
    %88 = arith.addf %86, %87 : vector<4x8x8xf32>
    %89 = math.sqrt %88 : vector<4x8x8xf32>
    %cst_20 = arith.constant 0.00999999977 : f32
    %90 = vector.broadcast %cst_20 : f32 to vector<4x8x8xf32>
    %91 = arith.subf %89, %90 : vector<4x8x8xf32>
    %92 = vector.shape_cast %19 : vector<4x8x8xf32> to vector<4x1x8x8xf32>
    %93 = vector.shape_cast %33 : vector<4x8x8xf32> to vector<4x1x8x8xf32>
    %94 = vector.shape_cast %57 : vector<4x8x8xf32> to vector<4x1x8x8xf32>
    %95 = vector.shape_cast %81 : vector<4x8x8xf32> to vector<4x1x8x8xf32>
    %96 = vector.shape_cast %91 : vector<4x8x8xf32> to vector<4x1x8x8xf32>
    %97 = vector.shape_cast %67 : vector<4x8x8xf32> to vector<4x1x8x8xf32>
    %98 = vector.shape_cast %43 : vector<4x8x8xf32> to vector<4x1x8x8xf32>
    %99 = tpu.concatenate %92, %93, %94, %95, %96, %97, %98 in 1 : vector<4x1x8x8xf32>, vector<4x1x8x8xf32>, vector<4x1x8x8xf32>, vector<4x1x8x8xf32>, vector<4x1x8x8xf32>, vector<4x1x8x8xf32>, vector<4x1x8x8xf32> -> vector<4x7x8x8xf32>
    %100 = vector.shape_cast %99 : vector<4x7x8x8xf32> to vector<28x64xf32>
    %c0_21 = arith.constant 0 : index
    %c0_22 = arith.constant 0 : index
    %c0_23 = arith.constant 0 : index
    %101 = vector.load %arg5[%c0_21, %c0_22, %c0_23] : memref<4x7x28xf32, #tpu.memory_space<vmem>>, vector<4x7x28xf32>
    %102 = vector.shape_cast %101 : vector<4x7x28xf32> to vector<28x28xf32>
    %cst_24 = arith.constant dense<0.000000e+00> : vector<28x64xf32>
    %103 = tpu.matmul %102, %100, %cst_24 {dimension_numbers = #tpu.dot_dimension_numbers<[0], [0], [1], [1], [0, 1, 1, 1], [], []>} : vector<28x28xf32>, vector<28x64xf32>, vector<28x64xf32> -> vector<28x64xf32>
    %c0_i32 = arith.constant 0 : i32
    %104 = arith.cmpi eq, %arg1, %c0_i32 : i32
    %105 = arith.extui %104 : i1 to i32
    %c0_i32_25 = arith.constant 0 : i32
    %106 = arith.cmpi ne, %105, %c0_i32_25 : i32
    scf.if %106 {
      %c0_32 = arith.constant 0 : index
      %c0_33 = arith.constant 0 : index
      %113 = vector.load %arg6[%c0_32, %c0_33] : memref<28x1xf32, #tpu.memory_space<vmem>>, vector<28x1xf32>
      %114 = vector.shape_cast %113 : vector<28x1xf32> to vector<28x1xf32>
      %115 = vector.broadcast %114 : vector<28x1xf32> to vector<28x64xf32>
      %c0_34 = arith.constant 0 : index
      %c0_35 = arith.constant 0 : index
      %c0_36 = arith.constant 0 : index
      %116 = vector.load %arg7[%c0_34, %c0_35, %c0_36] : memref<1x28x64xf32, #tpu.memory_space<vmem>>, vector<1x28x64xf32>
      %117 = vector.shape_cast %116 : vector<1x28x64xf32> to vector<28x64xf32>
      %118 = vector.shape_cast %115 : vector<28x64xf32> to vector<1x28x64xf32>
      tpu.vector_store %arg7[%c0_34, %c0_35, %c0_36], %118 {strides = array<i32>} : memref<1x28x64xf32, #tpu.memory_space<vmem>>, vector<1x28x64xf32>,
    } else {
    }
    %c0_26 = arith.constant 0 : index
    %c0_27 = arith.constant 0 : index
    %c0_28 = arith.constant 0 : index
    %107 = vector.load %arg7[%c0_26, %c0_27, %c0_28] : memref<1x28x64xf32, #tpu.memory_space<vmem>>, vector<1x28x64xf32>
    %108 = vector.shape_cast %107 : vector<1x28x64xf32> to vector<28x64xf32>
    %109 = arith.addf %108, %103 : vector<28x64xf32>
    %c0_29 = arith.constant 0 : index
    %c0_30 = arith.constant 0 : index
    %c0_31 = arith.constant 0 : index
    %110 = vector.load %arg7[%c0_29, %c0_30, %c0_31] : memref<1x28x64xf32, #tpu.memory_space<vmem>>, vector<1x28x64xf32>
    %111 = vector.shape_cast %110 : vector<1x28x64xf32> to vector<28x64xf32>
    %112 = vector.shape_cast %109 : vector<28x64xf32> to vector<1x28x64xf32>
    tpu.vector_store %arg7[%c0_29, %c0_30, %c0_31], %112 {strides = array<i32>} : memref<1x28x64xf32, #tpu.memory_space<vmem>>, vector<1x28x64xf32>,
    return
  }
  func.func @transform_0(%arg0: i32, %arg1: i32) -> (i32, i32, i32, i32) {
    %c0_i32 = arith.constant 0 : i32
    %c0_i32_0 = arith.constant 0 : i32
    %c0_i32_1 = arith.constant 0 : i32
    return %arg0, %arg1, %c0_i32, %c0_i32_0 : i32, i32, i32, i32
  }
  func.func @transform_1(%arg0: i32, %arg1: i32) -> (i32, i32) {
    %c0_i32 = arith.constant 0 : i32
    %c0_i32_0 = arith.constant 0 : i32
    %c0_i32_1 = arith.constant 0 : i32
    return %c0_i32, %c0_i32_0 : i32, i32
  }
  func.func @transform_2(%arg0: i32, %arg1: i32) -> (i32, i32) {
    %c0_i32 = arith.constant 0 : i32
    %c0_i32_0 = arith.constant 0 : i32
    %c0_i32_1 = arith.constant 0 : i32
    return %c0_i32, %c0_i32_0 : i32, i32
  }
  func.func @transform_3(%arg0: i32, %arg1: i32) -> (i32, i32, i32) {
    %c0_i32 = arith.constant 0 : i32
    %c0_i32_0 = arith.constant 0 : i32
    %c0_i32_1 = arith.constant 0 : i32
    return %arg1, %c0_i32, %c0_i32_0 : i32, i32, i32
  }
  func.func @transform_4(%arg0: i32, %arg1: i32) -> (i32, i32) {
    %c0_i32 = arith.constant 0 : i32
    %c0_i32_0 = arith.constant 0 : i32
    %c0_i32_1 = arith.constant 0 : i32
    return %c0_i32, %c0_i32_0 : i32, i32
  }
  func.func @transform_5(%arg0: i32, %arg1: i32) -> (i32, i32, i32) {
    %c0_i32 = arith.constant 0 : i32
    %c0_i32_0 = arith.constant 0 : i32
    %c0_i32_1 = arith.constant 0 : i32
    return %arg0, %c0_i32, %c0_i32_0 : i32, i32, i32
  }
}

</mosaic_0001>

<bundles_post_ra>
// kernel: _forward_impl.1
= control target key start
LH: loop header
LB: loop body
LE: loop exit
PB: predicated region body
PF: predicated region fallthrough
CT: control target
= control target key end

     0   :  { %s2117_s18 = smov 0   ;;  %s2119_s19 = smov 0   ;;  %s2969_s0 = inlined_call_operand.vmem [shape: bf16[2,4,16,16], index: 0, kind: input, shape index: {}]   ;;  %s2970_s1 = inlined_call_operand.vmem [shape: bf16[16,32], index: 1, kind: input, shape index: {}]   ;;  %s2971_s2 = inlined_call_operand.vmem [shape: bf16[32,16], index: 2, kind: input, shape index: {}]   ;;  %s2972_s3 = inlined_call_operand.vmem [shape: f32[4,7,28], index: 3, kind: input, shape index: {}]   ;;  %s2973_s4 = inlined_call_operand.vmem [shape: f32[28,1], index: 4, kind: input, shape index: {}]   ;;  %s2974_s5 = inlined_call_operand.vmem [shape: f32[2,28,64], index: 5, kind: output, shape index: {}]  }
   0x1   :  { %s2121_s20 = smov 0  }
   0x2 LB: > { %s27_s21 = sadd.s32 1, %s2069_s19  ;;  %p1838_p0 = scmp.ge.s32.totalorder %s2073_s20, 1  ;;  %s2073_s20 = sphi %s2121_s20, %s15_s20   ;;  %s2069_s19 = sphi %s2119_s19, %s2976_s19   ;;  %s2065_s18 = sphi %s2117_s18, %s2975_s18  }
   0x3   : > { %p29_p1 = scmp.ge.s32.totalorder %s27_s21, 2  ;;  %p218_p2 = scmp.lt.s32.totalorder %s2073_s20, 3 }
   0x5   : > { %s2978_s21 = smov (%p29_p1, %s27_s21), 0  ;;  %p219_p3 = pnand %p1838_p0, %p218_p2 }
   0x6   : > { %p257_p4 = scmp.lt.s32.totalorder (!%p219_p3), %s2065_s18, 1  ;;  %s2075_s7 = smov (!%p219_p3), 8  }
   0x7   : > { %222 = sbr.rel (%p219_p3) target bundleno = 1171 (0x493), region = 40  ;;  %s2076_s8 = smov (!%p219_p3), 120  }
   0x8   : > { %s2077_s9 = smov (!%p219_p3), 112   ;;  %s2080_s10 = smov (!%p219_p3), 40  }
   0x9   : > { %s2081_s11 = smov (!%p219_p3), 32   ;;  %s2082_s12 = smov (!%p219_p3), 16  }
   0xa   : > { %s2083_s13 = smov (!%p219_p3), 24   ;;  %s2084_s14 = smov (!%p219_p3), 48  }
   0xb   : > { %s2085_s15 = smov (!%p219_p3), 56  }
   0xc   : > { %v1912_v0 = vld [vmem:[%s2970_s1] sm:$0xff]  ;;  %s2980_s18 = smov (!%p257_p4, %s2065_s18), 1  ;;  %vm315_vm0 = vcmask 130048   ;;  %v1914_v20 = vld [vmem:[%s2971_s2 + $0x8] sm:$0xff] }
   0xd   : > { %335 = vmatpush.bf16.msra.mxu0 %v1912_v0  ;;  %s1906_s24 = sshll.u32 %s2980_s18, 5  ;;  %v1913_v12 = vld [vmem:[%s2971_s2] sm:$0xff] }
   0xe   : > { %s265_s27 = scalar_lea.vmem %s2969_s0, %s1906_s24 }
   0xf   : > { %v1908_v1 = vld [vmem:[%s265_s27] sm:$0xff]  ;;  %v1909_v2 = vld [vmem:[%s265_s27 + $0x8] sm:$0xff]  ;;  %v1910_v3 = vld [vmem:[%s265_s27 + $0x10] sm:$0xff] }
  0x10   : > { %1863 = vmatmul.msk.bf16.vlgmr.msra.gmra.mxu0 %vm315_vm0, %v1908_v1  ;;  %v1911_v4 = vld [vmem:[%s265_s27 + $0x18] sm:$0xff] }
  0x20   : > { %1864 = vmatmul.msk.bf16.gmra.mxu0 %vm315_vm0, %v1909_v2 }
  0x30   : > { %1865 = vmatmul.msk.bf16.gmra.mxu0 %vm315_vm0, %v1910_v3 }
  0x40   : > { %1866 = vmatmul.msk.bf16.gmra.mxu0 %vm315_vm0, %v1911_v4 }
  0x8d   : > { %v337_v5 = vpop.f32.mrf.mxu0 }
  0x8e   : > { %v357_v6 = vpack.c.bf16 %v337_v5, %v337_v5 }
  0x90   : > { %v381_v9 = vunpack.c.l.b16 %v357_v6 }
  0x95   : > { %v339_v7 = vpop.f32.mrf.mxu0 }
  0x96   : > { %v358_v8 = vpack.c.bf16 %v339_v7, %v339_v7 }
  0x98   : > { %v382_v10 = vunpack.c.l.b16 %v358_v8 }
  0x9a   : > { %v383_v11 = vpack.c.b16 %v382_v10, %v381_v9 }
  0x9c   : > { %398 = vmatpush.bf16.msra.mxu1 %v383_v11 }
  0x9d   : > { %v342_v13 = vpop.f32.mrf.mxu0 }
  0x9e   : > { %v359_v14 = vpack.c.bf16 %v342_v13, %v342_v13 }
  0x9f   : > { %1875 = vmatmul.msk.bf16.vlgmr.msra.gmra.mxu1 %vm315_vm0, %v1913_v12 }
  0xa0   : > { %v412_v17 = vunpack.c.l.b16 %v359_v14 }
  0xa5   : > { %v344_v15 = vpop.f32.mrf.mxu0 }
  0xa6   : > { %v360_v16 = vpack.c.bf16 %v344_v15, %v344_v15 }
  0xa8   : > { %v413_v18 = vunpack.c.l.b16 %v360_v16 }
  0xaa   : > { %v414_v19 = vpack.c.b16 %v413_v18, %v412_v17 }
  0xac   : > { %423 = vmatpush.bf16.msra.mxu2 %v414_v19 }
  0xad   : > { %v347_v21 = vpop.f32.mrf.mxu0 }
  0xae   : > { %v361_v22 = vpack.c.bf16 %v347_v21, %v347_v21 }
  0xaf   : > { %1876 = vmatmul.msk.bf16.gmra.mxu1 %vm315_vm0, %v1914_v20  ;;  %1877 = vmatmul.msk.bf16.vlgmr.msra.gmra.mxu2 %vm315_vm0, %v1913_v12 }
  0xb0   : > { %v437_v25 = vunpack.c.l.b16 %v361_v22 }
  0xb5   : > { %v349_v23 = vpop.f32.mrf.mxu0 }
  0xb6   : > { %v362_v24 = vpack.c.bf16 %v349_v23, %v349_v23 }
  0xb8   : > { %v438_v26 = vunpack.c.l.b16 %v362_v24 }
  0xba   : > { %v439_v27 = vpack.c.b16 %v438_v26, %v437_v25 }
  0xbc   : > { %448 = vmatpush.bf16.msra.mxu3 %v439_v27 }
  0xbd   : > { %v352_v28 = vpop.f32.mrf.mxu0 }
  0xbe   : > { %v363_v29 = vpack.c.bf16 %v352_v28, %v352_v28 }
  0xbf   : > { %1879 = vmatmul.msk.bf16.vlgmr.msra.gmra.mxu3 %vm315_vm0, %v1913_v12  ;;  %1878 = vmatmul.msk.bf16.gmra.mxu2 %vm315_vm0, %v1914_v20 }
  0xc0   : > { %v462_v32 = vunpack.c.l.b16 %v363_v29 }
  0xc5   : > { %v354_v30 = vpop.f32.mrf.mxu0 }
  0xc6   : > { %v364_v31 = vpack.c.bf16 %v354_v30, %v354_v30 }
  0xc8   : > { %v463_v33 = vunpack.c.l.b16 %v364_v31 }
  0xca   : > { %v464_v34 = vpack.c.b16 %v463_v33, %v462_v32 }
  0xcc   : > { %473 = vmatpush.bf16.msrb.mxu1 %v464_v34 }
  0xcf   : > { %1880 = vmatmul.msk.bf16.gmra.mxu3 %vm315_vm0, %v1914_v20  ;;  %1881 = vmatmul.msk.bf16.vlgmr.msrb.gmra.mxu1 %vm315_vm0, %v1913_v12 }
  0xdf   : > { %1882 = vmatmul.msk.bf16.gmra.mxu1 %vm315_vm0, %v1914_v20 }
 0x11c   : > { %v2164_v35 = vpop.f32.mrf.mxu1 }
 0x124   : > { %v2166_v36 = vpop.f32.mrf.mxu1 }
 0x125   : > { %753 = vrot.lane.b32.xlu0 %v2166_v36, %s2075_s7 }
 0x12c   : > { %v2170_v37 = vpop.f32.mrf.mxu1 }
 0x132   : > { %v2172_v38 = vpop.f32.mrf.mxu2 }
 0x134   : > { %v407_v39 = vpop.f32.mrf.mxu1 }
 0x135   : > { %557 = vrot.lane.b32.xlu1 %v407_v39, %s2075_s7 }
 0x13a   : > { %v2175_v40 = vpop.f32.mrf.mxu2 }
 0x13b   : > { %515 = vrot.lane.b32.xlu2 %v2175_v40, %s2076_s8 }
 0x13d   : > { %755 = vrot.lane.b32.xlu1 %v2175_v40, %s2075_s7 }
 0x142   : > { %v2181_v41 = vpop.f32.mrf.mxu3  ;;  %v2183_v42 = vpop.f32.mrf.mxu2 }
 0x14a   : > { %v2185_v43 = vpop.f32.mrf.mxu3  ;;  %v432_v45 = vpop.f32.mrf.mxu2 }
 0x14b   : > { %757 = vrot.lane.b32.xlu2 %v2185_v43, %s2075_s7 }
 0x14c   : > { %v2189_v44 = vpop.f32.mrf.mxu1 }
 0x152   : > { %v2191_v46 = vpop.f32.mrf.mxu3 }
 0x153   : > { %559 = vrot.lane.b32.xlu2 %v432_v45, %s2075_s7 }
 0x154   : > { %v2194_v47 = vpop.f32.mrf.mxu1 }
 0x155   : > { %759 = vrot.lane.b32.xlu1 %v2194_v47, %s2075_s7 }
 0x15a   : > { %v457_v48 = vpop.f32.mrf.mxu3 }
 0x15b   : > { %561 = vrot.lane.b32.xlu0 %v457_v48, %s2075_s7  ;;  %519 = vrot.lane.b32.xlu2 %v2194_v47, %s2076_s8 }
 0x15c   : > { %v2201_v49 = vpop.f32.mrf.mxu1 }
 0x15d   : > { %513 = vrot.lane.b32.xlu1 %v2166_v36, %s2076_s8 }
 0x163   : > { %541 = vrot.lane.b32.xlu0 %v457_v48, %s2076_s8  ;;  %539 = vrot.lane.b32.xlu2 %v432_v45, %s2076_s8 }
 0x164   : > { %v482_v50 = vpop.f32.mrf.mxu1 }
 0x165   : > { %543 = vrot.lane.b32.xlu1 %v482_v50, %s2076_s8 }
 0x16b   : > { %563 = vrot.lane.b32.xlu0 %v482_v50, %s2075_s7 }
 0x173   : > { %517 = vrot.lane.b32.xlu0 %v2185_v43, %s2076_s8 }
 0x17b   : > { %537 = vrot.lane.b32.xlu0 %v407_v39, %s2076_s8 }
 0x195   : > { %v2214_v54 = vpop.permute.xlu2 %515 }
 0x197   : > { %v754_v51 = vpop.permute.xlu0 %753 }
 0x198   : > { %v765_v52 = vadd.f32 %v754_v51, %v2164_v35  ;;  %v857_v7 = vsub.f32 %v2164_v35, %v754_v51 }
 0x19a   : > { %v769_v53 = vmul.f32 %v765_v52, %v765_v52  ;;  %v861_v8 = vmul.f32 %v857_v7, %v857_v7 }
 0x19c   : > { %777 = vrot.lane.b32.xlu2 %v769_v53, %s2076_s8 }
 0x1a5   : > { %v758_v55 = vpop.permute.xlu2 %757 }
 0x1a6   : > { %v767_v56 = vadd.f32 %v758_v55, %v2181_v41  ;;  %v859_v59 = vsub.f32 %v2181_v41, %v758_v55 }
 0x1a7   : > { %v558_v57 = vpop.permute.xlu1 %557 }
 0x1a8   : > { %v771_v58 = vmul.f32 %v767_v56, %v767_v56  ;;  %v863_v61 = vmul.f32 %v859_v59, %v859_v59  ;;  %v569_v15 = vadd.f32 %v558_v57, %v2170_v37  ;;  %v661_v22 = vsub.f32 %v2170_v37, %v558_v57 }
 0x1aa   : > { %781 = vrot.lane.b32.xlu2 %v771_v58, %s2076_s8  ;;  %v573_v18 = vmul.f32 %v569_v15, %v569_v15  ;;  %v665_v23 = vmul.f32 %v661_v22, %v661_v22 }
 0x1ad   : > { %v560_v2 = vpop.permute.xlu2 %559 }
 0x1ae   : > { %v570_v3 = vadd.f32 %v560_v2, %v2183_v42  ;;  %v662_v4 = vsub.f32 %v2183_v42, %v560_v2 }
 0x1af   : > { %v756_v60 = vpop.permute.xlu1 %755 }
 0x1b0   : > { %v766_v62 = vadd.f32 %v756_v60, %v2172_v38  ;;  %v858_v63 = vsub.f32 %v2172_v38, %v756_v60  ;;  %v574_v5 = vmul.f32 %v570_v3, %v570_v3  ;;  %v666_v6 = vmul.f32 %v662_v4, %v662_v4 }
 0x1b1   : > { %v850_v3 = vadd.f32 %v2214_v54, %v2172_v38  ;;  %v746_v4 = vsub.f32 %v2172_v38, %v2214_v54 }
 0x1b2   : > { %v770_v0 = vmul.f32 %v766_v62, %v766_v62  ;;  %v862_v1 = vmul.f32 %v858_v63, %v858_v63  ;;  %873 = vrot.lane.b32.xlu2 %v863_v61, %s2076_s8 }
 0x1b4   : > { %871 = vrot.lane.b32.xlu1 %v862_v1, %s2076_s8  ;;  %779 = vrot.lane.b32.xlu0 %v770_v0, %s2076_s8 }
 0x1b5   : > { %v2256_v29 = vpop.permute.xlu2 %519 }
 0x1b6   : > { %v852_v2 = vadd.f32 %v2256_v29, %v2189_v44 }
 0x1b8   : > { %v856_v7 = vmul.f32 %v852_v2, %v852_v2 }
 0x1bc   : > { %675 = vrot.lane.b32.xlu1 %v666_v6, %s2076_s8  ;;  %583 = vrot.lane.b32.xlu0 %v574_v5, %s2076_s8 }
 0x1bd   : > { %v540_v30 = vpop.permute.xlu2 %539 }
 0x1be   : > { %v550_v22 = vsub.f32 %v2183_v42, %v540_v30 }
 0x1c4   : > { %869 = vrot.lane.b32.xlu1 %v861_v8, %s2076_s8  ;;  %v854_v8 = vmul.f32 %v850_v3, %v850_v3 }
 0x1c7   : > { %v760_v9 = vpop.permute.xlu1 %759 }
 0x1c8   : > { %v768_v10 = vadd.f32 %v760_v9, %v2189_v44  ;;  %v860_v11 = vsub.f32 %v2189_v44, %v760_v9 }
 0x1ca   : > { %v772_v12 = vmul.f32 %v768_v10, %v768_v10  ;;  %v864_v13 = vmul.f32 %v860_v11, %v860_v11  ;;  %v750_v11 = vmul.f32 %v746_v4, %v746_v4 }
 0x1cc   : > { %875 = vrot.lane.b32.xlu2 %v864_v13, %s2076_s8  ;;  %491 = vrot.lane.b32.xlu1 %v2172_v38, %s2076_s8 }
 0x1cd   : > { %783 = vrot.lane.b32.xlu0 %v772_v12, %s2076_s8  ;;  %v562_v14 = vpop.permute.xlu0 %561 }
 0x1ce   : > { %v571_v16 = vadd.f32 %v562_v14, %v2191_v46  ;;  %v663_v17 = vsub.f32 %v2191_v46, %v562_v14 }
 0x1cf   : > { %v2266_v55 = vpop.permute.xlu1 %513 }
 0x1d0   : > { %v575_v19 = vmul.f32 %v571_v16, %v571_v16  ;;  %v667_v20 = vmul.f32 %v663_v17, %v663_v17  ;;  %v745_v57 = vsub.f32 %v2164_v35, %v2266_v55  ;;  %v849_v4 = vadd.f32 %v2266_v55, %v2164_v35 }
 0x1d2   : > { %v749_v59 = vmul.f32 %v745_v57, %v745_v57 }
 0x1d4   : > { %581 = vrot.lane.b32.xlu2 %v573_v18, %s2076_s8  ;;  %585 = vrot.lane.b32.xlu1 %v575_v19, %s2076_s8  ;;  %v654_v18 = vadd.f32 %v540_v30, %v2183_v42 }
 0x1d5   : > { %677 = vrot.lane.b32.xlu0 %v667_v20, %s2076_s8  ;;  %v2242_v21 = vpop.permute.xlu0 %541 }
 0x1d6   : > { %v551_v3 = vsub.f32 %v2191_v46, %v2242_v21 }
 0x1d7   : > { %v2274_v61 = vpop.permute.xlu1 %543 }
 0x1dc   : > { %493 = vrot.lane.b32.xlu2 %v2181_v41, %s2076_s8 }
 0x1dd   : > { %673 = vrot.lane.b32.xlu0 %v665_v23, %s2076_s8  ;;  %v564_v24 = vpop.permute.xlu0 %563 }
 0x1de   : > { %v664_v25 = vsub.f32 %v2201_v49, %v564_v24  ;;  %v572_v27 = vadd.f32 %v564_v24, %v2201_v49 }
 0x1e0   : > { %v668_v26 = vmul.f32 %v664_v25, %v664_v25  ;;  %v576_v28 = vmul.f32 %v572_v27, %v572_v27  ;;  %v658_v27 = vmul.f32 %v654_v18, %v654_v18  ;;  %v2333_v18 = vmul.f32 %v551_v3, %v551_v3 }
 0x1e2   : > { %679 = vrot.lane.b32.xlu1 %v668_v26, %s2076_s8 }
 0x1e4   : > { %489 = vrot.lane.b32.xlu2 %v2164_v35, %s2076_s8 }
 0x1e5   : > { %495 = vrot.lane.b32.xlu0 %v2189_v44, %s2076_s8  ;;  %v2258_v32 = vpop.permute.xlu0 %517 }
 0x1e6   : > { %v747_v34 = vsub.f32 %v2181_v41, %v2258_v32  ;;  %v851_v45 = vadd.f32 %v2258_v32, %v2181_v41 }
 0x1e8   : > { %v751_v39 = vmul.f32 %v747_v34, %v747_v34  ;;  %v855_v51 = vmul.f32 %v851_v45, %v851_v45 }
 0x1ea   : > { %587 = vrot.lane.b32.xlu1 %v576_v28, %s2076_s8  ;;  %v748_v28 = vsub.f32 %v2189_v44, %v2256_v29 }
 0x1ed   : > { %v2277_v63 = vpop.permute.xlu0 %537 }
 0x1f6   : > { %v778_v31 = vpop.permute.xlu2 %777 }
 0x1f7   : > { %v789_v60 = vadd.f32 %v778_v31, %v749_v59  ;;  %v554_v31 = vmul.f32 %v550_v22, %v550_v22 }
 0x1f9   : > { %v2279_v1 = vadd.f32 0.0001, %v789_v60 }
 0x1fb   : > { %vm804_vm15 = vcmp.eq.f32.partialorder %v2279_v1, inf }
 0x204   : > { %v782_v33 = vpop.permute.xlu2 %781 }
 0x205   : > { %v791_v48 = vadd.f32 %v782_v33, %v751_v39 }
 0x207   : > { %v2264_v52 = vadd.f32 0.0001, %v791_v48 }
 0x209   : > { %2019 = vrsqrt.f32 %v2264_v52  ;;  %vm828_vm1 = vcmp.eq.f32.partialorder %v2264_v52, inf  ;;  %vm830_vm2 = vcmp.eq.f32.partialorder %v2264_v52, 0.0 }
 0x20c   : > { %v874_v50 = vpop.permute.xlu2 %873 }
 0x20d   : > { %v883_v53 = vadd.f32 %v874_v50, %v855_v51 }
 0x20f   : > { %v2269_v56 = vadd.f32 0.0001, %v883_v53  ;;  %v2020_v58 = vpop.eup %2019  ;;  %v2308_v53 = vmul.f32 %v748_v28, %v748_v28 }
 0x210   : > { %v822_v62 = vmul.f32 %v2020_v58, %v2264_v52 }
 0x211   : > { %2021 = vrsqrt.f32 %v2269_v56  ;;  %vm920_vm3 = vcmp.eq.f32.partialorder %v2269_v56, inf  ;;  %vm922_vm4 = vcmp.eq.f32.partialorder %v2269_v56, 0.0 }
 0x212   : > { %v823_v5 = vmul.f32 %v2020_v58, %v822_v62  ;;  %2023 = vrsqrt.f32 %v2279_v1 }
 0x214   : > { %v824_v12 = vmul.f32 0.5, %v823_v5 }
 0x216   : > { %v825_v24 = vsub.f32 1.5, %v824_v12 }
 0x217   : > { %v2022_v0 = vpop.eup %2021 }
 0x218   : > { %v914_v6 = vmul.f32 %v2022_v0, %v2269_v56  ;;  %v2297_v25 = vpop.eup %2023  ;;  %v826_v34 = vmul.f32 %v2020_v58, %v825_v24 }
 0x219   : > { %v798_v42 = vmul.f32 %v2297_v25, %v2279_v1 }
 0x21a   : > { %v915_v16 = vmul.f32 %v2022_v0, %v914_v6  ;;  %v827_v60 = vmul.f32 %v826_v34, %v2264_v52 }
 0x21b   : > { %v799_v58 = vmul.f32 %v2297_v25, %v798_v42 }
 0x21c   : > { %v916_v26 = vmul.f32 0.5, %v915_v16 }
 0x21e   : > { %v917_v45 = vsub.f32 1.5, %v916_v26  ;;  %v2340_v26 = vadd.f32 %v2277_v63, %v2170_v37 }
 0x220   : > { %v918_v6 = vmul.f32 %v2022_v0, %v917_v45 }
 0x226   : > { %v876_v9 = vpop.permute.xlu2 %875  ;;  %v872_v10 = vpop.permute.xlu1 %871 }
 0x227   : > { %v884_v13 = vadd.f32 %v876_v9, %v856_v7  ;;  %v882_v14 = vadd.f32 %v872_v10, %v854_v8  ;;  %v780_v15 = vpop.permute.xlu0 %779  ;;  %v655_v7 = vadd.f32 %v2242_v21, %v2191_v46  ;;  %v549_v10 = vsub.f32 %v2170_v37, %v2277_v63 }
 0x228   : > { %v790_v17 = vadd.f32 %v780_v15, %v750_v11  ;;  %v2329_v15 = vmul.f32 0.5, %v799_v58  ;;  %v853_v46 = vmul.f32 %v849_v4, %v849_v4  ;;  %v831_v21 = vand.u32 2147483648, %v2264_v52 }
 0x229   : > { %v2290_v19 = vadd.f32 0.0001, %v884_v13  ;;  %v2292_v20 = vadd.f32 0.0001, %v882_v14  ;;  %v829_v13 = vsel %vm828_vm1, %v2264_v52, %v827_v60  ;;  %v2335_v22 = vmul.f32 %v655_v7, %v655_v7 }
 0x22a   : > { %v2295_v23 = vadd.f32 0.0001, %v790_v17  ;;  %v919_v17 = vmul.f32 %v918_v6, %v2269_v56  ;;  %v553_v34 = vmul.f32 %v549_v10, %v549_v10  ;;  %v923_v58 = vand.u32 2147483648, %v2269_v56 }
 0x22b   : > { %2025 = vrsqrt.f32 %v2290_v19  ;;  %vm908_vm5 = vcmp.eq.f32.partialorder %v2292_v20, inf  ;;  %vm910_vm6 = vcmp.eq.f32.partialorder %v2292_v20, 0.0  ;;  %vm932_vm7 = vcmp.eq.f32.partialorder %v2290_v19, inf }
 0x22c   : > { %2027 = vrsqrt.f32 %v2292_v20  ;;  %v921_v60 = vsel %vm920_vm3, %v2269_v56, %v919_v17  ;;  %vm934_vm8 = vcmp.eq.f32.partialorder %v2290_v19, 0.0  ;;  %vm816_vm9 = vcmp.eq.f32.partialorder %v2295_v23, inf }
 0x22d   : > { %2029 = vrsqrt.f32 %v2295_v23  ;;  %vm818_vm10 = vcmp.eq.f32.partialorder %v2295_v23, 0.0  ;;  %vm806_vm3 = vcmp.eq.f32.partialorder %v2279_v1, 0.0 }
 0x22e   : > { %v676_v33 = vpop.permute.xlu1 %675  ;;  %v582_v42 = vpop.permute.xlu2 %581 }
 0x22f   : > { %v686_v30 = vadd.f32 %v676_v33, %v658_v27  ;;  %v584_v39 = vpop.permute.xlu0 %583  ;;  %v832_v27 = vsel %vm830_vm2, %v831_v21, %v829_v13  ;;  %v593_v3 = vadd.f32 %v582_v42, %v553_v34 }
 0x230   : > { %v594_v48 = vadd.f32 %v584_v39, %v554_v31  ;;  %v801_v39 = vsub.f32 1.5, %v2329_v15  ;;  %v1893_v37 = vadd.f32 -0.01, %v832_v27 }
 0x231   : > { %v2026_v50 = vpop.eup %2025  ;;  %v2306_v51 = vadd.f32 0.0001, %v686_v30 }
 0x232   : > { %v2028_v57 = vpop.eup %2027  ;;  %v2310_v59 = vadd.f32 0.0001, %v594_v48  ;;  %v926_v62 = vmul.f32 %v2026_v50, %v2290_v19 }
 0x233   : > { %v2030_v2 = vpop.eup %2029  ;;  %v902_v5 = vmul.f32 %v2028_v57, %v2292_v20  ;;  %2031 = vrsqrt.f32 %v2306_v51  ;;  %vm712_vm11 = vcmp.eq.f32.partialorder %v2306_v51, inf  ;;  %vm714_vm12 = vcmp.eq.f32.partialorder %v2306_v51, 0.0 }
 0x234   : > { %v927_v8 = vmul.f32 %v2026_v50, %v926_v62  ;;  %v810_v9 = vmul.f32 %v2030_v2, %v2295_v23  ;;  %2033 = vrsqrt.f32 %v2310_v59  ;;  %vm620_vm13 = vcmp.eq.f32.partialorder %v2310_v59, inf }
 0x235   : > { %v903_v11 = vmul.f32 %v2028_v57, %v902_v5  ;;  %vm622_vm14 = vcmp.eq.f32.partialorder %v2310_v59, 0.0 }
 0x236   : > { %v870_v12 = vpop.permute.xlu1 %869  ;;  %v928_v0 = vmul.f32 0.5, %v927_v8  ;;  %v811_v14 = vmul.f32 %v2030_v2, %v810_v9  ;;  %v924_v9 = vsel %vm922_vm4, %v923_v58, %v921_v60 }
 0x237   : > { %v904_v16 = vmul.f32 0.5, %v903_v11 }
 0x238   : > { %v812_v24 = vmul.f32 0.5, %v811_v14  ;;  %v929_v31 = vsub.f32 1.5, %v928_v0  ;;  %v2360_v0 = vadd.f32 0.0001, %v593_v3  ;;  %v881_v14 = vadd.f32 %v870_v12, %v853_v46 }
 0x239   : > { %v905_v28 = vsub.f32 1.5, %v904_v16  ;;  %v2032_v33 = vpop.eup %2031 }
 0x23a   : > { %v813_v30 = vsub.f32 1.5, %v812_v24  ;;  %v2034_v45 = vpop.eup %2033  ;;  %v706_v52 = vmul.f32 %v2032_v33, %v2306_v51  ;;  %v930_v5 = vmul.f32 %v2026_v50, %v929_v31  ;;  %v2372_v34 = vadd.f32 0.0001, %v881_v14 }
 0x23b   : > { %v906_v48 = vmul.f32 %v2028_v57, %v905_v28  ;;  %v614_v62 = vmul.f32 %v2034_v45, %v2310_v59  ;;  %v911_v57 = vand.u32 2147483648, %v2292_v20  ;;  %v657_v14 = vmul.f32 %v2340_v26, %v2340_v26 }
 0x23c   : > { %v814_v63 = vmul.f32 %v2030_v2, %v813_v30  ;;  %v707_v6 = vmul.f32 %v2032_v33, %v706_v52  ;;  %v931_v16 = vmul.f32 %v930_v5, %v2290_v19 }
 0x23d   : > { %v907_v4 = vmul.f32 %v906_v48, %v2292_v20  ;;  %v615_v8 = vmul.f32 %v2034_v45, %v614_v62 }
 0x23e   : > { %v2350_v7 = vpop.permute.xlu1 %491  ;;  %v708_v11 = vmul.f32 0.5, %v707_v6  ;;  %v815_v13 = vmul.f32 %v814_v63, %v2295_v23  ;;  %v933_v42 = vsel %vm932_vm7, %v2290_v19, %v931_v16 }
 0x23f   : > { %v784_v10 = vpop.permute.xlu0 %783  ;;  %v909_v2 = vsel %vm908_vm5, %v2292_v20, %v907_v4  ;;  %v935_v20 = vand.u32 2147483648, %v2290_v19  ;;  %v616_v27 = vmul.f32 0.5, %v615_v8 }
 0x240   : > { %v792_v56 = vadd.f32 %v784_v10, %v2308_v53  ;;  %v912_v50 = vsel %vm910_vm6, %v911_v57, %v909_v2  ;;  %v709_v24 = vsub.f32 1.5, %v708_v11  ;;  %v819_v53 = vand.u32 2147483648, %v2295_v23 }
 0x241   : > { %v1896_v21 = vadd.f32 -0.01, %v912_v50  ;;  %v817_v12 = vsel %vm816_vm9, %v2295_v23, %v815_v13  ;;  %v617_v46 = vsub.f32 1.5, %v616_v27  ;;  %v936_v58 = vsel %vm934_vm8, %v935_v20, %v933_v42 }
 0x242   : > { %v2363_v17 = vadd.f32 0.0001, %v792_v56  ;;  %v710_v31 = vmul.f32 %v2032_v33, %v709_v24  ;;  %v715_v33 = vand.u32 2147483648, %v2306_v51  ;;  %v820_v63 = vsel %vm818_vm10, %v819_v53, %v817_v12 }
 0x243   : > { %v1952_v28 = vpack.i.bf16 %v1896_v21, %v1893_v37  ;;  %v618_v52 = vmul.f32 %v2034_v45, %v617_v46  ;;  %v623_v23 = vand.u32 2147483648, %v2310_v59  ;;  %v1897_v11 = vadd.f32 -0.01, %v924_v9 }
 0x244   : > { %2035 = vrsqrt.f32 %v2363_v17  ;;  %v711_v48 = vmul.f32 %v710_v31, %v2306_v51  ;;  %v802_v21 = vmul.f32 %v2297_v25, %v801_v39  ;;  %v656_v20 = vadd.f32 %v2274_v61, %v2201_v49 }
 0x245   : > { %2037 = vrsqrt.f32 %v2360_v0  ;;  %1953 = vrot.lane.b32.xlu0 %v1952_v28, %s2077_s9  ;;  %v619_v4 = vmul.f32 %v618_v52, %v2310_v59  ;;  %v552_v52 = vsub.f32 %v2201_v49, %v2274_v61  ;;  %vm840_vm1 = vcmp.eq.f32.partialorder %v2363_v17, inf }
 0x246   : > { %v586_v30 = vpop.permute.xlu1 %585  ;;  %v713_v3 = vsel %vm712_vm11, %v2306_v51, %v711_v48  ;;  %2039 = vrsqrt.f32 %v2372_v34  ;;  %v1898_v51 = vadd.f32 -0.01, %v936_v58  ;;  %v803_v25 = vmul.f32 %v802_v21, %v2279_v1 }
 0x247   : > { %v595_v60 = vadd.f32 %v586_v30, %v2333_v18  ;;  %v678_v37 = vpop.permute.xlu0 %677  ;;  %v716_v45 = vsel %vm714_vm12, %v715_v33, %v713_v3  ;;  %v621_v19 = vsel %vm620_vm13, %v2310_v59, %v619_v4  ;;  %v660_v39 = vmul.f32 %v656_v20, %v656_v20 }
 0x248   : > { %v687_v62 = vadd.f32 %v678_v37, %v2335_v22  ;;  %v2398_v57 = vadd.f32 -0.01, %v716_v45  ;;  %v1892_v22 = vadd.f32 -0.01, %v820_v63  ;;  %v624_v10 = vsel %vm622_vm14, %v623_v23, %v621_v19 }
 0x249   : > { %v2393_v18 = vadd.f32 0.0001, %v595_v60  ;;  %v2409_v50 = vadd.f32 -0.01, %v624_v10  ;;  %v843_v63 = vand.u32 2147483648, %v2363_v17  ;;  %v805_v58 = vsel %vm804_vm15, %v2279_v1, %v803_v25 }
 0x24a   : > { %v2036_v5 = vpop.eup %2035  ;;  %v2396_v6 = vadd.f32 0.0001, %v687_v62  ;;  %v1962_v56 = vpack.i.bf16 %v2398_v57, %v1892_v22  ;;  %vm842_vm2 = vcmp.eq.f32.partialorder %v2363_v17, 0.0  ;;  %v807_v19 = vand.u32 2147483648, %v2279_v1 }
 0x24b   : > { %v2401_v8 = vpop.eup %2037  ;;  %2041 = vrsqrt.f32 %v2393_v18  ;;  %v834_v2 = vmul.f32 %v2036_v5, %v2363_v17  ;;  %v1957_v59 = vpack.i.bf16 %v2409_v50, %v1897_v11  ;;  %vm632_vm4 = vcmp.eq.f32.partialorder %v2393_v18, inf }
 0x24c   : > { %2043 = vrsqrt.f32 %v2396_v6  ;;  %1963 = vrot.lane.b32.xlu1 %v1962_v56, %s2077_s9  ;;  %v2419_v16 = vpop.eup %2039  ;;  %v602_v48 = vmul.f32 %v2401_v8, %v2360_v0  ;;  %vm634_vm5 = vcmp.eq.f32.partialorder %v2393_v18, 0.0  ;;  %vm1006_vm6 = vcmask 1047556  }
 0x24d   : > { %983 = vrot.lane.b32.xlu0 %v1898_v51, %s2077_s9  ;;  %v835_v13 = vmul.f32 %v2036_v5, %v834_v2  ;;  %1958 = vrot.lane.b32.xlu2 %v1957_v59, %s2077_s9  ;;  %v890_v46 = vmul.f32 %v2419_v16, %v2372_v34  ;;  %v556_v2 = vmul.f32 %v552_v52, %v552_v52  ;;  %vm608_vm9 = vcmp.eq.f32.partialorder %v2360_v0, inf }
 0x24e   : > { %v603_v23 = vmul.f32 %v2401_v8, %v602_v48  ;;  %vm896_vm10 = vcmp.eq.f32.partialorder %v2372_v34, inf  ;;  %vm724_vm13 = vcmp.eq.f32.partialorder %v2396_v6, inf  ;;  %vm898_vm14 = vcmp.eq.f32.partialorder %v2372_v34, 0.0 }
 0x24f   : > { %v674_v9 = vpop.permute.xlu0 %673  ;;  %v836_v24 = vmul.f32 0.5, %v835_v13  ;;  %v891_v49 = vmul.f32 %v2419_v16, %v890_v46  ;;  %vm726_vm15 = vcmp.eq.f32.partialorder %v2396_v6, 0.0 }
 0x250   : > { %v685_v27 = vadd.f32 %v674_v9, %v657_v14  ;;  %v604_v59 = vmul.f32 0.5, %v603_v23  ;;  %v635_v9 = vand.u32 2147483648, %v2393_v18 }
 0x251   : > { %v2042_v28 = vpop.eup %2041  ;;  %v837_v26 = vsub.f32 1.5, %v836_v24  ;;  %v892_v11 = vmul.f32 0.5, %v891_v49 }
 0x252   : > { %v2424_v53 = vpop.eup %2043  ;;  %v2426_v31 = vadd.f32 0.0001, %v685_v27  ;;  %v626_v15 = vmul.f32 %v2042_v28, %v2393_v18 }
 0x253   : > { %v838_v12 = vmul.f32 %v2036_v5, %v837_v26  ;;  %v718_v33 = vmul.f32 %v2424_v53, %v2396_v6 }
 0x254   : > { %2045 = vrsqrt.f32 %v2426_v31  ;;  %v680_v42 = vpop.permute.xlu1 %679  ;;  %v627_v30 = vmul.f32 %v2042_v28, %v626_v15  ;;  %vm700_vm7 = vcmp.eq.f32.partialorder %v2426_v31, inf  ;;  %vm702_vm8 = vcmp.eq.f32.partialorder %v2426_v31, 0.0 }
 0x255   : > { %v688_v60 = vadd.f32 %v680_v42, %v660_v39  ;;  %v839_v37 = vmul.f32 %v838_v12, %v2363_v17  ;;  %v719_v5 = vmul.f32 %v2424_v53, %v718_v33  ;;  %v893_v39 = vsub.f32 1.5, %v892_v11 }
 0x256   : > { %v628_v62 = vmul.f32 0.5, %v627_v30  ;;  %v1156_v12 = vrot.slane %v2398_v57, 4  ;;  %v605_v33 = vsub.f32 1.5, %v604_v59 }
 0x257   : > { %v2444_v3 = vadd.f32 0.0001, %v688_v60  ;;  %v841_v4 = vsel %vm840_vm1, %v2363_v17, %v839_v37  ;;  %v808_v17 = vsel %vm806_vm3, %v807_v19, %v805_v58  ;;  %v720_v21 = vmul.f32 0.5, %v719_v5 }
 0x258   : > { %v844_v61 = vsel %vm842_vm2, %v843_v63, %v841_v4  ;;  %v629_v45 = vsub.f32 1.5, %v628_v62  ;;  %v1891_v27 = vadd.f32 -0.01, %v808_v17  ;;  %v894_v62 = vmul.f32 %v2419_v16, %v893_v39 }
 0x259   : > { %2047 = vrsqrt.f32 %v2444_v3  ;;  %v1894_v22 = vadd.f32 -0.01, %v844_v61  ;;  %v721_v30 = vsub.f32 1.5, %v720_v21  ;;  %v606_v5 = vmul.f32 %v2401_v8, %v605_v33 }
 0x25a   : > { %v2046_v51 = vpop.eup %2045  ;;  %v630_v10 = vmul.f32 %v2042_v28, %v629_v45  ;;  %v703_v45 = vand.u32 2147483648, %v2426_v31  ;;  %vm736_vm11 = vcmp.eq.f32.partialorder %v2444_v3, inf  ;;  %vm738_vm12 = vcmp.eq.f32.partialorder %v2444_v3, 0.0 }
 0x25b   : > { %967 = vrot.lane.b32.xlu1 %v1894_v22, %s2077_s9  ;;  %v694_v56 = vmul.f32 %v2046_v51, %v2426_v31  ;;  %v722_v4 = vmul.f32 %v2424_v53, %v721_v30  ;;  %v895_v53 = vmul.f32 %v894_v62, %v2372_v34  ;;  %v607_v17 = vmul.f32 %v606_v5, %v2360_v0 }
 0x25c   : > { %v588_v13 = vpop.permute.xlu1 %587  ;;  %v631_v14 = vmul.f32 %v630_v10, %v2393_v18  ;;  %vm610_vm1 = vcmp.eq.f32.partialorder %v2360_v0, 0.0 }
 0x25d   : > { %v596_v20 = vadd.f32 %v588_v13, %v556_v2  ;;  %v695_v24 = vmul.f32 %v2046_v51, %v694_v56  ;;  %v723_v10 = vmul.f32 %v722_v4, %v2396_v6  ;;  %v897_v13 = vsel %vm896_vm10, %v2372_v34, %v895_v53  ;;  %v496_v4 = vpop.permute.xlu0 %495 }
 0x25e   : > { %v633_v1 = vsel %vm632_vm4, %v2393_v18, %v631_v14  ;;  %v2078_v53 = vmov 1983009808   ;;  %vm1510_vm4 = vcmask 64512   ;;  %vm1539_vm10 = vcmask 457728  }
 0x25f   : > { %v2048_v28 = vpop.eup %2047  ;;  %v2461_v26 = vadd.f32 0.0001, %v596_v20  ;;  %v636_v15 = vsel %vm634_vm5, %v635_v9, %v633_v1  ;;  %v696_v25 = vmul.f32 0.5, %v695_v24  ;;  %v725_v59 = vsel %vm724_vm13, %v2396_v6, %v723_v10 }
 0x260   : > { %v1885_v46 = vadd.f32 -0.01, %v636_v15  ;;  %v730_v42 = vmul.f32 %v2048_v28, %v2444_v3  ;;  %v899_v20 = vand.u32 2147483648, %v2372_v34  ;;  %v727_v9 = vand.u32 2147483648, %v2396_v6 }
 0x261   : > { %2049 = vrsqrt.f32 %v2461_v26  ;;  %v697_v48 = vsub.f32 1.5, %v696_v25  ;;  %v609_v1 = vsel %vm608_vm9, %v2360_v0, %v607_v17  ;;  %vm644_vm2 = vcmp.eq.f32.partialorder %v2461_v26, inf }
 0x262   : > { %v1967_v52 = vpack.i.bf16 %v1891_v27, %v1885_v46  ;;  %v1154_v18 = vrot.slane %v1885_v46, 4  ;;  %v2467_v60 = vsel %vm1006_vm6, %v1885_v46, %v1156_v12  ;;  %v731_v37 = vmul.f32 %v2048_v28, %v730_v42 }
 0x263   : > { %v698_v63 = vmul.f32 %v2046_v51, %v697_v48  ;;  %v728_v15 = vsel %vm726_vm15, %v727_v9, %v725_v59  ;;  %v647_v42 = vand.u32 2147483648, %v2461_v26  ;;  %vm646_vm3 = vcmp.eq.f32.partialorder %v2461_v26, 0.0 }
 0x264   : > { %1968 = vrot.lane.b32.xlu0 %v1967_v52, %s2077_s9  ;;  %v732_v58 = vmul.f32 0.5, %v731_v37  ;;  %v2474_v49 = vsel %vm1006_vm6, %v1154_v18, %v2398_v57  ;;  %v1889_v46 = vadd.f32 -0.01, %v728_v15  ;;  %v2079_v9 = vmov 1934713408  }
 0x265   : > { %v699_v61 = vmul.f32 %v698_v63, %v2426_v31  ;;  %vm1519_vm5 = vcmask 195584   ;;  %vm1664_vm9 = vcmask 1043456  }
 0x266   : > { %v733_v23 = vsub.f32 1.5, %v732_v58  ;;  %v1256_v52 = vrot.slane %v1889_v46, 4  ;;  %v494_v58 = vpop.permute.xlu2 %493 }
 0x267   : > { %v2050_v22 = vpop.eup %2049  ;;  %v701_v16 = vsel %vm700_vm7, %v2426_v31, %v699_v61  ;;  %v739_v31 = vand.u32 2147483648, %v2444_v3  ;;  %vm1529_vm7 = vcmask 326656  }
 0x268   : > { %v704_v19 = vsel %vm702_vm8, %v703_v45, %v701_v16  ;;  %v734_v51 = vmul.f32 %v2048_v28, %v733_v23  ;;  %v638_v57 = vmul.f32 %v2050_v22, %v2461_v26  ;;  %v900_v28 = vsel %vm898_vm14, %v899_v20, %v897_v13 }
 0x269   : > { %v2487_v2 = vadd.f32 -0.01, %v704_v19  ;;  %v1895_v39 = vadd.f32 -0.01, %v900_v28  ;;  %v1011_v19 = vunpack.c.l.s4 %v2078_v53  ;;  %vm1534_vm8 = vcmask 392192  }
 0x26a   : > { %v735_v8 = vmul.f32 %v734_v51, %v2444_v3  ;;  %v639_v56 = vmul.f32 %v2050_v22, %v638_v57 }
 0x26b   : > { %v2539_v17 = vunpack.c.0.s8 %v1011_v19 }
 0x26c   : > { %993 = vrot.lane.b32.xlu0 %v2487_v2, %s2077_s9  ;;  %v737_v11 = vsel %vm736_vm11, %v2444_v3, %v735_v8  ;;  %v640_v14 = vmul.f32 0.5, %v639_v56  ;;  %v611_v3 = vand.u32 2147483648, %v2360_v0  ;;  %vm1725_vm11 = vcmask 523264  }
 0x26d   : > { %v740_v21 = vsel %vm738_vm12, %v739_v31, %v737_v11  ;;  %v502_v11 = vadd.f32 %v2350_v7, %v2172_v38  ;;  %vm1729_vm12 = vcmask 519168  }
 0x26e   : > { %v2503_v24 = vadd.f32 -0.01, %v740_v21  ;;  %v641_v27 = vsub.f32 1.5, %v640_v14  ;;  %v612_v25 = vsel %vm610_vm1, %v611_v3, %v609_v1  ;;  %v490_v45 = vpop.permute.xlu2 %489  ;;  %v504_v21 = vadd.f32 %v496_v4, %v2189_v44 }
 0x26f   : > { %v2516_v6 = vadd.f32 -0.01, %v612_v25  ;;  %v501_v10 = vadd.f32 %v490_v45, %v2164_v35  ;;  %v2548_v35 = vperm.slane %v2474_v49, %v2539_v17  ;;  %v1059_v1 = vunpack.c.l.s4 %v2079_v9 }
 0x270   : > { %999 = vrot.lane.b32.xlu2 %v2503_v24, %s2077_s9  ;;  %v642_v34 = vmul.f32 %v2050_v22, %v641_v27  ;;  %v506_v38 = vadd.f32 %v502_v11, %v2175_v40  ;;  %v508_v3 = vadd.f32 %v504_v21, %v2194_v47 }
 0x271   : > { %v1977_v33 = vpack.i.bf16 %v1895_v39, %v2516_v6  ;;  %v505_v13 = vadd.f32 %v501_v10, %v2166_v36  ;;  %v1190_v44 = vrot.slane %v2548_v35, 4  ;;  %v2567_v15 = vunpack.c.0.s8 %v1059_v1 }
 0x272   : > { %v643_v12 = vmul.f32 %v642_v34, %v2461_v26  ;;  %v526_v25 = vadd.f32 %v2214_v54, %v506_v38  ;;  %v528_v47 = vadd.f32 %v2256_v29, %v508_v3  ;;  %v1354_v29 = vrot.slane %v2503_v24, 4 }
 0x273   : > { %v525_v49 = vadd.f32 %v2266_v55, %v505_v13  ;;  %v1020_v10 = vrot.slane %v2516_v6, 4 }
 0x274   : > { %v645_v30 = vsel %vm644_vm2, %v2461_v26, %v643_v12  ;;  %v503_v26 = vadd.f32 %v494_v58, %v2181_v41  ;;  %v2591_v4 = vmul.f32 0.35355338, %v528_v47 }
 0x275   : > { %v648_v48 = vsel %vm646_vm3, %v647_v42, %v645_v30  ;;  %v1120_v42 = vrot.slane %v2409_v50, 4 }
 0x276   : > { %v1886_v0 = vadd.f32 -0.01, %v648_v48  ;;  %v507_v61 = vadd.f32 %v503_v26, %v2185_v43 }
 0x278   : > { %1978 = vrot.lane.b32.xlu2 %v1977_v33, %s2077_s9  ;;  %v1254_v18 = vrot.slane %v1886_v0, 4  ;;  %v1972_v37 = vpack.i.bf16 %v1886_v0, %v1889_v46  ;;  %v2523_v63 = vsel %vm1006_vm6, %v1886_v0, %v1256_v52  ;;  %v527_v5 = vadd.f32 %v2258_v32, %v507_v61 }
 0x279   : > { %v2585_v0 = vmul.f32 0.35355338, %v526_v25  ;;  %v1165_v61 = vperm.slane %v2467_v60, %v2539_v17  ;;  %v2605_v53 = vperm.slane %v2523_v63, %v2539_v17 }
 0x27a   : > { %1973 = vrot.lane.b32.xlu1 %v1972_v37, %s2077_s9  ;;  %v2527_v62 = vsel %vm1006_vm6, %v1254_v18, %v1889_v46  ;;  %v531_v16 = vmul.f32 0.35355338, %v527_v5  ;;  %v529_v46 = vmul.f32 0.35355338, %v525_v49 }
 0x27b   : > { %v2612_v60 = vperm.slane %v2527_v62, %v2539_v17  ;;  %v1202_v13 = vrot.slane %v1165_v61, 4  ;;  %v1316_v1 = vrot.slane %v2605_v53, 4 }
 0x27c   : > { %v1142_v41 = vrot.slane %v531_v16, 4  ;;  %v1008_v58 = vrot.slane %v529_v46, 4 }
 0x2a7   : > { %v2535_v51 = vpop.permute.xlu2 %1958 }
 0x2a8   : > { %v1961_v8 = vunpack.i.h.bf16 %v2535_v51 }
 0x2aa   : > { %v1132_v39 = vrot.slane %v1961_v8, 4 }
 0x2b7   : > { %v2531_v23 = vpop.permute.xlu0 %1953 }
 0x2b8   : > { %v1956_v22 = vunpack.i.h.bf16 %v2531_v23  ;;  %v1955_v63 = vunpack.i.l.bf16 %v2531_v23 }
 0x2ba   : > { %v1130_v57 = vrot.slane %v1956_v22, 4  ;;  %v1133_v30 = vsel %vm1006_vm6, %v1956_v22, %v1132_v39  ;;  %v2638_v3 = vrot.slane %v1955_v63, 4 }
 0x2bc   : > { %v1131_v56 = vsel %vm1006_vm6, %v1130_v57, %v1961_v8  ;;  %v1042_v8 = vrot.slane %v2585_v0, 4 }
 0x2bd   : > { %v2552_v20 = vperm.slane %v1131_v56, %v2539_v17 }
 0x2be   : > { %v1964_v43 = vpop.permute.xlu1 %1963 }
 0x2bf   : > { %v1966_v31 = vunpack.i.h.bf16 %v1964_v43  ;;  %v1965_v32 = vunpack.i.l.bf16 %v1964_v43  ;;  %v1166_v28 = vrot.slane %v2552_v20, 4  ;;  %v984_v40 = vpop.permute.xlu0 %983 }
 0x2c0   : > { %v1356_v54 = vrot.slane %v984_v40, 4  ;;  %v1355_v5 = vsel %vm1006_vm6, %v1354_v29, %v984_v40 }
 0x2c1   : > { %v1143_v14 = vsel %vm1006_vm6, %v1142_v41, %v1966_v31  ;;  %v1118_v59 = vrot.slane %v1965_v32, 4  ;;  %v1144_v52 = vrot.slane %v1966_v31, 4  ;;  %v1121_v18 = vsel %vm1006_vm6, %v1965_v32, %v1120_v42 }
 0x2c2   : > { %v2555_v27 = vperm.slane %v1143_v14, %v2539_v17  ;;  %v1129_v45 = vperm.slane %v1121_v18, %v2539_v17  ;;  %v1357_v22 = vsel %vm1006_vm6, %v2503_v24, %v1356_v54  ;;  %v1960_v41 = vunpack.i.l.bf16 %v2535_v51 }
 0x2c3   : > { %v1119_v36 = vsel %vm1006_vm6, %v1118_v59, %v2409_v50  ;;  %v1141_v50 = vperm.slane %v1133_v30, %v2539_v17  ;;  %v1145_v19 = vsel %vm1006_vm6, %v531_v16, %v1144_v52  ;;  %v1268_v24 = vrot.slane %v2591_v4, 4 }
 0x2c4   : > { %v2561_v7 = vperm.slane %v1119_v36, %v2539_v17  ;;  %v1191_v34 = vsel %vm1006_vm6, %v1190_v44, %v2555_v27  ;;  %v2618_v31 = vperm.slane %v1355_v5, %v2539_v17  ;;  %v2621_v16 = vperm.slane %v1357_v22, %v2539_v17 }
 0x2c5   : > { %v2583_v33 = vperm.slane %v1191_v34, %v2567_v15  ;;  %v1178_v43 = vrot.slane %v1141_v50, 4  ;;  %v1030_v32 = vrot.slane %v2487_v2, 4  ;;  %v1153_v11 = vperm.slane %v1145_v19, %v2539_v17 }
 0x2c6   : > { %v1167_v55 = vsel %vm1006_vm6, %v1166_v28, %v2561_v7  ;;  %v1192_v14 = vrot.slane %v2555_v27, 4  ;;  %v1180_v59 = vrot.slane %v1129_v45, 4  ;;  %v2632_v36 = vrot.slane %v1960_v41, 4 }
 0x2c7   : > { %v2580_v48 = vperm.slane %v1167_v55, %v2567_v15  ;;  %v1214_v37 = vrot.slane %v2583_v33, 4  ;;  %v1179_v62 = vsel %vm1006_vm6, %v1178_v43, %v1129_v45  ;;  %v1304_v44 = vrot.slane %v2612_v60, 4 }
 0x2c8   : > { %v1366_v27 = vrot.slane %v2618_v31, 4  ;;  %v1378_v28 = vrot.slane %v2621_v16, 4  ;;  %v2643_v34 = vperm.slane %v1179_v62, %v2567_v15  ;;  %v1204_v25 = vrot.slane %v1153_v11, 4 }
 0x2c9   : > { %v2595_v26 = vsel %vm1006_vm6, %v1214_v37, %v2580_v48  ;;  %v1203_v55 = vsel %vm1006_vm6, %v1202_v13, %v1153_v11  ;;  %v1181_v30 = vsel %vm1006_vm6, %v1141_v50, %v1180_v59  ;;  %v1193_v54 = vsel %vm1006_vm6, %v2548_v35, %v1192_v14 }
 0x2ca   : > { %v2572_v12 = vpop.permute.xlu2 %999  ;;  %v1168_v52 = vrot.slane %v2561_v7, 4  ;;  %v2662_v50 = vperm.slane %v1203_v55, %v2567_v15  ;;  %v2666_v7 = vperm.slane %v1181_v30, %v2567_v15 }
 0x2cc   : > { %v1169_v13 = vsel %vm1006_vm6, %v2552_v20, %v1168_v52  ;;  %v1342_v20 = vrot.slane %v2572_v12, 4 }
 0x2cd   : > { %v968_v45 = vpop.permute.xlu1 %967  ;;  %v2700_v30 = vperm.slane %v1169_v13, %v2567_v15 }
 0x2d2   : > { %v1979_v57 = vpop.permute.xlu2 %1978 }
 0x2d3   : > { %v1980_v56 = vunpack.i.l.bf16 %v1979_v57  ;;  %v1981_v21 = vunpack.i.h.bf16 %v1979_v57 }
 0x2d5   : > { %v1005_v38 = vrot.slane %v1980_v56, 4  ;;  %v1031_v42 = vsel %vm1006_vm6, %v1030_v32, %v1981_v21  ;;  %v1009_v37 = vsel %vm1006_vm6, %v1980_v56, %v1008_v58  ;;  %v1032_v5 = vrot.slane %v1981_v21, 4 }
 0x2d6   : > { %v2627_v9 = vpop.permute.xlu0 %1968  ;;  %v1037_v35 = vperm.slane %v1031_v42, %v2539_v17  ;;  %v2670_v58 = vperm.slane %v1193_v54, %v2567_v15  ;;  %v2674_v57 = vperm.slane %v1009_v37, %v2539_v17  ;;  %v1205_v56 = vsel %vm1006_vm6, %v1165_v61, %v1204_v25 }
 0x2d7   : > { %v1971_v49 = vunpack.i.h.bf16 %v2627_v9  ;;  %v1007_v18 = vsel %vm1006_vm6, %v1005_v38, %v529_v46  ;;  %v1224_v46 = vrot.slane %v2643_v34, 4  ;;  %v1344_v32 = vrot.slane %v968_v45, 4 }
 0x2d8   : > { %v1033_v14 = vsel %vm1006_vm6, %v2487_v2, %v1032_v5  ;;  %v1970_v61 = vunpack.i.l.bf16 %v2627_v9 }
 0x2d9   : > { %v1018_v39 = vrot.slane %v1971_v49, 4  ;;  %v1021_v40 = vsel %vm1006_vm6, %v1971_v49, %v1020_v10  ;;  %v1080_v49 = vrot.slane %v1037_v35, 4  ;;  %v1345_v55 = vsel %vm1006_vm6, %v2572_v12, %v1344_v32 }
 0x2da   : > { %v2649_v47 = vperm.slane %v1021_v40, %v2539_v17  ;;  %v1213_v40 = vperm.slane %v1205_v56, %v2567_v15  ;;  %v1232_v37 = vrot.slane %v1970_v61, 4  ;;  %v1228_v12 = vrot.slane %v2666_v7, 4 }
 0x2db   : > { %v1019_v29 = vsel %vm1006_vm6, %v1018_v39, %v2516_v6  ;;  %v1013_v6 = vperm.slane %v1007_v18, %v2539_v17  ;;  %v2720_v13 = vsel %vm1006_vm6, %v2662_v50, %v1224_v46  ;;  %v1231_v51 = vsel %vm1006_vm6, %v2632_v36, %v1970_v61 }
 0x2dc   : > { %v1025_v22 = vperm.slane %v1019_v29, %v2539_v17  ;;  %v1066_v19 = vrot.slane %v2649_v47, 4 }
 0x2dd   : > { %v1056_v54 = vrot.slane %v1013_v6, 4 }
 0x2de   : > { %v1054_v10 = vrot.slane %v1025_v22, 4  ;;  %v994_v43 = vpop.permute.xlu0 %993  ;;  %v1067_v38 = vsel %vm1006_vm6, %v1066_v19, %v2674_v57  ;;  %v1353_v19 = vperm.slane %v1345_v55, %v2539_v17 }
 0x2df   : > { %v1043_v11 = vsel %vm1006_vm6, %v1042_v8, %v994_v43  ;;  %v1044_v62 = vrot.slane %v994_v43, 4  ;;  %v1073_v9 = vperm.slane %v1067_v38, %v2567_v15  ;;  %v1057_v43 = vsel %vm1006_vm6, %v1025_v22, %v1056_v54 }
 0x2e0   : > { %v1049_v59 = vperm.slane %v1043_v11, %v2539_v17  ;;  %v1055_v21 = vsel %vm1006_vm6, %v1054_v10, %v1013_v6  ;;  %v1233_v22 = vsel %vm1006_vm6, %v1960_v41, %v1232_v37  ;;  %v1065_v46 = vperm.slane %v1057_v43, %v2567_v15 }
 0x2e1   : > { %v1045_v8 = vsel %vm1006_vm6, %v2585_v0, %v1044_v62  ;;  %v1061_v25 = vperm.slane %v1055_v21, %v2567_v15  ;;  %v2703_v0 = vperm.slane %v1033_v14, %v2539_v17  ;;  %v1112_v11 = vrot.slane %v1073_v9, 4 }
 0x2e2   : > { %v2692_v39 = vperm.slane %v1045_v8, %v2539_v17  ;;  %v1078_v2 = vrot.slane %v1049_v59, 4  ;;  %v1081_v42 = vsel %vm1006_vm6, %v1049_v59, %v1080_v49  ;;  %v1343_v62 = vsel %vm1006_vm6, %v1342_v20, %v968_v45 }
 0x2e3   : > { %v1104_v5 = vrot.slane %v1061_v25, 4  ;;  %v1089_v56 = vperm.slane %v1081_v42, %v2567_v15  ;;  %v1220_v14 = vrot.slane %v2700_v30, 4  ;;  %v1226_v59 = vrot.slane %v1213_v40, 4 }
 0x2e4   : > { %v1090_v52 = vrot.slane %v2692_v39, 4  ;;  %v1079_v18 = vsel %vm1006_vm6, %v1078_v2, %v1037_v35  ;;  %v1380_v45 = vrot.slane %v1353_v19, 4  ;;  %v1218_v20 = vrot.slane %v2670_v58, 4 }
 0x2e5   : > { %v1085_v29 = vperm.slane %v1079_v18, %v2567_v15  ;;  %v1106_v8 = vrot.slane %v1089_v56, 4  ;;  %v2737_v2 = vsel %vm1006_vm6, %v1213_v40, %v1228_v12  ;;  %v2741_v55 = vperm.slane %v1343_v62, %v2539_v17 }
 0x2e6   : > { %v1091_v10 = vsel %vm1006_vm6, %v1090_v52, %v2703_v0  ;;  %v1241_v42 = vperm.slane %v1233_v22, %v2539_v17  ;;  %v2747_v52 = vsel %vm1006_vm6, %v2670_v58, %v1220_v14  ;;  %v2751_v36 = vsel %vm1006_vm6, %v1226_v59, %v2666_v7 }
 0x2e7   : > { %v1102_v6 = vrot.slane %v1085_v29, 4  ;;  %v1105_v32 = vsel %vm1006_vm6, %v1085_v29, %v1104_v5  ;;  %v1097_v35 = vperm.slane %v1091_v10, %v2567_v15  ;;  %v1216_v18 = vrot.slane %v2580_v48, 4 }
 0x2e8   : > { %1402 = vrot.lane.b32.xlu2 %v1105_v32, %s2075_s7  ;;  %v1237_v37 = vperm.slane %v1231_v51, %v2539_v17  ;;  %v1107_v29 = vsel %vm1006_vm6, %v1106_v8, %v1065_v46  ;;  %v1108_v5 = vrot.slane %v1065_v46, 4  ;;  %v1381_v12 = vsel %vm1006_vm6, %v2621_v16, %v1380_v45 }
 0x2e9   : > { %v1113_v21 = vsel %vm1006_vm6, %v1097_v35, %v1112_v11  ;;  %v1110_v38 = vrot.slane %v1097_v35, 4  ;;  %v2728_v49 = vsel %vm1006_vm6, %v1102_v6, %v1061_v25  ;;  %v1222_v25 = vrot.slane %v2662_v50, 4 }
 0x2ea   : > { %1466 = vrot.lane.b32.xlu1 %v1113_v21, %s2080_s10  ;;  %v2779_v11 = vperm.slane %v1381_v12, %v2567_v15  ;;  %v1280_v23 = vrot.slane %v1237_v37, 4  ;;  %v1367_v48 = vsel %vm1006_vm6, %v1366_v27, %v2741_v55 }
 0x2eb   : > { %v1111_v41 = vsel %vm1006_vm6, %v1110_v38, %v1073_v9  ;;  %v1379_v9 = vsel %vm1006_vm6, %v1378_v28, %v1353_v19  ;;  %v1292_v28 = vrot.slane %v1241_v42, 4  ;;  %v1223_v58 = vsel %vm1006_vm6, %v1222_v25, %v2643_v34 }
 0x2ec   : > { %v1974_v54 = vpop.permute.xlu1 %1973  ;;  %1450 = vrot.lane.b32.xlu0 %v1111_v41, %s2081_s11  ;;  %v2770_v35 = vperm.slane %v1379_v9, %v2567_v15 }
 0x2ed   : > { %v1976_v61 = vunpack.i.h.bf16 %v1974_v54  ;;  %v1975_v40 = vunpack.i.l.bf16 %v1974_v54 }
 0x2ef   : > { %v1266_v10 = vrot.slane %v1976_v61, 4  ;;  %v1242_v43 = vrot.slane %v1975_v40, 4  ;;  %v1245_v7 = vsel %vm1006_vm6, %v1975_v40, %v2638_v3  ;;  %v1269_v6 = vsel %vm1006_vm6, %v1976_v61, %v1268_v24 }
 0x2f0   : > { %v1253_v19 = vperm.slane %v1245_v7, %v2539_v17  ;;  %v1277_v32 = vperm.slane %v1269_v6, %v2539_v17  ;;  %1418 = vrot.lane.b32.xlu2 %v1107_v29, %s2082_s12  ;;  %v1109_v24 = vsel %vm1006_vm6, %v1089_v56, %v1108_v5 }
 0x2f1   : > { %v1243_v16 = vsel %vm1006_vm6, %v1242_v43, %v1955_v63  ;;  %v1267_v3 = vsel %vm1006_vm6, %v1266_v10, %v2591_v4 }
 0x2f2   : > { %v1249_v62 = vperm.slane %v1243_v16, %v2539_v17  ;;  %v1273_v14 = vperm.slane %v1267_v3, %v2539_v17  ;;  %v1290_v59 = vrot.slane %v1253_v19, 4  ;;  %v1293_v22 = vsel %vm1006_vm6, %v1253_v19, %v1292_v28  ;;  %1434 = vrot.lane.b32.xlu1 %v1109_v24, %s2083_s13 }
 0x2f3   : > { %v1314_v63 = vrot.slane %v1277_v32, 4  ;;  %v1301_v21 = vperm.slane %v1293_v22, %v2567_v15  ;;  %v1317_v4 = vsel %vm1006_vm6, %v1277_v32, %v1316_v1  ;;  %v2846_v22 = vperm.slane %v1367_v48, %v2567_v15 }
 0x2f4   : > { %v1278_v56 = vrot.slane %v1249_v62, 4  ;;  %v1302_v38 = vrot.slane %v1273_v14, 4  ;;  %1456 = vrot.lane.b32.xlu0 %v2770_v35, %s2081_s11  ;;  %v1325_v17 = vperm.slane %v1317_v4, %v2567_v15  ;;  %v1291_v45 = vsel %vm1006_vm6, %v1290_v59, %v1241_v42 }
 0x2f5   : > { %v1340_v46 = vrot.slane %v1301_v21, 4  ;;  %v1297_v8 = vperm.slane %v1291_v45, %v2567_v15  ;;  %v1315_v51 = vsel %vm1006_vm6, %v1314_v63, %v2605_v53  ;;  %v1281_v41 = vsel %vm1006_vm6, %v1249_v62, %v1280_v23 }
 0x2f6   : > { %v1321_v54 = vperm.slane %v1315_v51, %v2567_v15  ;;  %v1289_v1 = vperm.slane %v1281_v41, %v2567_v15  ;;  %v1305_v61 = vsel %vm1006_vm6, %v1273_v14, %v1304_v44  ;;  %v1338_v40 = vrot.slane %v1325_v17, 4 }
 0x2f7   : > { %v1341_v9 = vsel %vm1006_vm6, %v1325_v17, %v1340_v46  ;;  %v1336_v42 = vrot.slane %v1297_v8, 4  ;;  %v1313_v29 = vperm.slane %v1305_v61, %v2567_v15  ;;  %v1279_v5 = vsel %vm1006_vm6, %v1278_v56, %v1237_v37 }
 0x2f8   : > { %v1982_v53 = vpack.i.bf16 %v2737_v2, %v1341_v9  ;;  %v1332_v12 = vrot.slane %v1289_v1, 4  ;;  %v1339_v10 = vsel %vm1006_vm6, %v1338_v40, %v1301_v21  ;;  %v1285_v43 = vperm.slane %v1279_v5, %v2567_v15  ;;  %v1546_v5 = vld [vmem:[%s2972_s3 + $0x10] sm:$0x7f] }
 0x2f9   : > { %v1337_v7 = vsel %vm1006_vm6, %v1321_v54, %v1336_v42  ;;  %v1997_v6 = vpack.i.bf16 %v2751_v36, %v1339_v10  ;;  %v1303_v44 = vsel %vm1006_vm6, %v1302_v38, %v2612_v60  ;;  %v1330_v28 = vrot.slane %v1313_v29, 4 }
 0x2fa   : > { %1488 = vrot.lane.b32.xlu1 %v2779_v11, %s2084_s14  ;;  %1983 = vrot.lane.b32.xlu2 %v1982_v53, %s2085_s15  ;;  %v1992_v2 = vpack.i.bf16 %v2720_v13, %v1337_v7  ;;  %v1333_v37 = vsel %vm1006_vm6, %v1313_v29, %v1332_v12  ;;  %v1309_v19 = vperm.slane %v1303_v44, %v2567_v15  ;;  %v1328_v32 = vrot.slane %v1285_v43, 4 }
 0x2fb   : > { %v1987_v36 = vpack.i.bf16 %v2747_v52, %v1333_v37  ;;  %v1219_v60 = vsel %vm1006_vm6, %v1218_v20, %v2700_v30  ;;  %v1331_v16 = vsel %vm1006_vm6, %v1330_v28, %v1289_v1  ;;  %v1334_v3 = vrot.slane %v1321_v54, 4 }
 0x2fc   : > { %1993 = vrot.lane.b32.xlu0 %v1992_v2, %s2080_s10  ;;  %v1217_v13 = vsel %vm1006_vm6, %v2583_v33, %v1216_v18  ;;  %v1326_v24 = vrot.slane %v1309_v19, 4  ;;  %v1329_v62 = vsel %vm1006_vm6, %v1309_v19, %v1328_v32  ;;  %v2007_v14 = vpack.i.bf16 %v1219_v60, %v1331_v16  ;;  %v1547_v2 = vld [vmem:[%s2972_s3 + $0x18] sm:$0x7f] }
 0x2fd   : > { %v1394_v52 = vrot.slane %v2770_v35, 4  ;;  %v2002_v59 = vpack.i.bf16 %v1217_v13, %v1329_v62  ;;  %v1335_v30 = vsel %vm1006_vm6, %v1334_v3, %v1297_v8  ;;  %v1368_v18 = vrot.slane %v2741_v55, 4 }
 0x2fe   : > { %v2012_v33 = vpack.i.bf16 %v1223_v58, %v1335_v30  ;;  %v2841_v20 = vsel %vm1006_vm6, %v1326_v24, %v1285_v43  ;;  %v1390_v34 = vrot.slane %v2846_v22, 4  ;;  %v1092_v55 = vrot.slane %v2703_v0, 4 }
 0x2ff   : > { %v1395_v35 = vsel %vm1006_vm6, 0.0, %v1394_v52  ;;  %v1369_v27 = vsel %vm1006_vm6, %v2618_v31, %v1368_v18  ;;  %v1396_v23 = vrot.slane %v2779_v11, 4  ;;  %v1068_v31 = vrot.slane %v2674_v57, 4 }
 0x300   : > { %v1377_v50 = vperm.slane %v1369_v27, %v2567_v15  ;;  %v1391_v25 = vsel %vm1006_vm6, 0.0, %v1390_v34  ;;  %v1093_v63 = vsel %vm1006_vm6, %v2692_v39, %v1092_v55  ;;  %v1564_v10 = vrot.slane %v1546_v5, 1 }
 0x301   : > { %v1397_v21 = vsel %vm1006_vm6, 0.0, %v1396_v23  ;;  %v1101_v4 = vperm.slane %v1093_v63, %v2567_v15  ;;  %v1069_v0 = vsel %vm1006_vm6, %v2649_v47, %v1068_v31  ;;  %v1544_v47 = vld [vmem:[%s2972_s3] sm:$0x7f]  ;;  %v1565_v43 = vrot.slane %v1546_v5, 2 }
 0x302   : > { %1472 = vrot.lane.b32.xlu2 %v1395_v35, %s2080_s10  ;;  %1988 = vrot.lane.b32.xlu1 %v1987_v36, %s2083_s13  ;;  %v1392_v56 = vrot.slane %v1377_v50, 4  ;;  %v1077_v11 = vperm.slane %v1069_v0, %v2567_v15  ;;  %v1545_v15 = vld [vmem:[%s2972_s3 + $0x8] sm:$0x7f]  ;;  %v1552_v46 = vrot.slane %v1544_v47, 1  ;;  %v1553_v8 = vrot.slane %v1544_v47, 2 }
 0x303   : > { %v1114_v38 = vrot.slane %v1101_v4, 4  ;;  %v1554_v51 = vrot.slane %v1544_v47, 3  ;;  %1576 = vst [vmem:[#allocation1] ss:$9 sm:$0xff] %v1544_v47  ;;  %v1555_v41 = vrot.slane %v1544_v47, 4  ;;  %v1556_v54 = vrot.slane %v1544_v47, 5 }
 0x304   : > { %1998 = vrot.lane.b32.xlu0 %v1997_v6, %s2084_s14  ;;  %v1393_v39 = vsel %vm1006_vm6, 0.0, %v1392_v56  ;;  %v1116_v17 = vrot.slane %v1077_v11, 4  ;;  %1590 = vst [vmem:[#allocation1 + $0x7] ss:$9 sm:$0xff] %v1545_v15  ;;  %v1557_v1 = vrot.slane %v1544_v47, 6  ;;  %v1558_v61 = vrot.slane %v1545_v15, 1 }
 0x305   : > { %v1115_v57 = vsel %vm1006_vm6, %v1114_v38, %v1077_v11  ;;  %1578 = vst [vmem:[#allocation1 + $0x1] ss:$9 sm:$0xff] %v1552_v46  ;;  %v1559_v40 = vrot.slane %v1545_v15, 2  ;;  %v1560_v9 = vrot.slane %v1545_v15, 3  ;;  %v1561_v29 = vrot.slane %v1545_v15, 4 }
 0x306   : > { %v1117_v45 = vsel %vm1006_vm6, %v1101_v4, %v1116_v17  ;;  %1580 = vst [vmem:[#allocation1 + $0x2] ss:$9 sm:$0xff] %v1553_v8  ;;  %v1562_v53 = vrot.slane %v1545_v15, 5  ;;  %v1563_v12 = vrot.slane %v1545_v15, 6  ;;  %v1566_v6 = vrot.slane %v1546_v5, 3 }
 0x307   : > { %1582 = vst [vmem:[#allocation1 + $0x3] ss:$9 sm:$0xff] %v1554_v51  ;;  %v1567_v44 = vrot.slane %v1546_v5, 4  ;;  %v1568_v37 = vrot.slane %v1546_v5, 5  ;;  %v1569_v19 = vrot.slane %v1546_v5, 6  ;;  %v1570_v32 = vrot.slane %v1547_v2, 1 }
 0x308   : > { %1584 = vst [vmem:[#allocation1 + $0x4] ss:$9 sm:$0xff] %v1555_v41  ;;  %v1571_v36 = vrot.slane %v1547_v2, 2  ;;  %v1572_v13 = vrot.slane %v1547_v2, 3  ;;  %v1573_v24 = vrot.slane %v1547_v2, 4  ;;  %v1574_v62 = vrot.slane %v1547_v2, 5 }
 0x309   : > { %1586 = vst [vmem:[#allocation1 + $0x5] ss:$9 sm:$0xff] %v1556_v54  ;;  %vm1524_vm6 = vcmask 261120  }
 0x30a   : > { %1424 = vrot.lane.b32.xlu2 %v1377_v50, %s2082_s12  ;;  %1408 = vrot.lane.b32.xlu1 %v1391_v25, %s2075_s7  ;;  %1588 = vst [vmem:[#allocation1 + $0x6] ss:$9 sm:$0xff] %v1557_v1 }
 0x30c   : > { %2003 = vrot.lane.b32.xlu0 %v2002_v59, %s2075_s7 }
 0x311   : > { %v1591_v42 = vld [vmem:[#allocation1] sm:$0xff] }
 0x312   : > { %1504 = vrot.lane.b32.xlu1 %v1397_v21, %s2085_s15  ;;  %2008 = vrot.lane.b32.xlu2 %v2007_v14, %s2082_s12  ;;  %1592 = vst [vmem:[#allocation1] ss:$9 sm:$0xff] %v1558_v61  ;;  %v1575_v14 = vrot.slane %v1547_v2, 6 }
 0x313   : > { %1593 = vst [vmem:[#allocation1 + $0x1] ss:$9 sm:$0xff] %v1559_v40 }
 0x314   : > { %2013 = vrot.lane.b32.xlu0 %v2012_v33, %s2081_s11  ;;  %1594 = vst [vmem:[#allocation1 + $0x2] ss:$9 sm:$0xff] %v1560_v9 }
 0x315   : > { %1595 = vst [vmem:[#allocation1 + $0x3] ss:$9 sm:$0xff] %v1561_v29 }
 0x316   : > { %1596 = vst [vmem:[#allocation1 + $0x4] ss:$9 sm:$0xff] %v1562_v53 }
 0x317   : > { %1597 = vst [vmem:[#allocation1 + $0x5] ss:$9 sm:$0xff] %v1563_v12 }
 0x318   : > { %1598 = vst [vmem:[#allocation1 + $0x6] ss:$9 sm:$0xff] %v1546_v5 }
 0x319   : > { %1599 = vst [vmem:[#allocation1 + $0x7] ss:$9 sm:$0xff] %v1564_v10 }
 0x31a   : > { %1440 = vrot.lane.b32.xlu1 %v1393_v39, %s2083_s13  ;;  %1482 = vrot.lane.b32.xlu2 %v1115_v57, %s2084_s14  ;;  %s277_s14 = scalar_lea.vmem %s2974_s5, %s1906_s24 }
 0x31c   : > { %1498 = vrot.lane.b32.xlu0 %v1117_v45, %s2085_s15 }
 0x320   : > { %v1600_v28 = vld [vmem:[#allocation1] sm:$0xff] }
 0x321   : > { %1601 = vst [vmem:[#allocation1] ss:$9 sm:$0xff] %v1565_v43 }
 0x322   : > { %1602 = vst [vmem:[#allocation1 + $0x1] ss:$9 sm:$0xff] %v1566_v6 }
 0x323   : > { %1603 = vst [vmem:[#allocation1 + $0x2] ss:$9 sm:$0xff] %v1567_v44 }
 0x324   : > { %1604 = vst [vmem:[#allocation1 + $0x3] ss:$9 sm:$0xff] %v1568_v37 }
 0x325   : > { %1605 = vst [vmem:[#allocation1 + $0x4] ss:$9 sm:$0xff] %v1569_v19 }
 0x326   : > { %1606 = vst [vmem:[#allocation1 + $0x5] ss:$9 sm:$0xff] %v1547_v2 }
 0x327   : > { %1607 = vst [vmem:[#allocation1 + $0x6] ss:$9 sm:$0xff] %v1570_v32 }
 0x328   : > { %1608 = vst [vmem:[#allocation1 + $0x7] ss:$9 sm:$0xff] %v1571_v36 }
 0x32f   : > { %v1609_v52 = vld [vmem:[#allocation1] sm:$0xff] }
 0x330   : > { %1610 = vst [vmem:[#allocation1] ss:$9 sm:$0xff] %v1572_v13 }
 0x331   : > { %1611 = vst [vmem:[#allocation1 + $0x1] ss:$9 sm:$0xff] %v1573_v24 }
 0x332   : > { %1612 = vst [vmem:[#allocation1 + $0x2] ss:$9 sm:$0xff] %v1574_v62  ;;  %v1702_v62 = vld [vmem:[%s2973_s4 + $0x8] sm:$0xff] }
 0x333   : > { %1613 = vst [vmem:[#allocation1 + $0x3] ss:$9 sm:$0xff] %v1575_v14  ;;  %v1701_v14 = vld [vmem:[%s2973_s4] sm:$0xff] }
 0x33a   : > { %v1614_v18 = vld [vmem:[#allocation1] sm:$0xff] }
 0x342   : > { %v2887_v7 = vpop.permute.xlu2 %1402 }
 0x343   : > { %v1511_v61 = vsel %vm1510_vm4, %v2728_v49, %v2887_v7 }
 0x34a   : > { %v1419_v60 = vpop.permute.xlu2 %1418 }
 0x34f   : > { %1619 = vxpose.xlu1.b32.start [1/4] (short) (narrow) %v1591_v42, 32  ;;  %v1515_v42 = vsel %vm315_vm0, %v1511_v61, %v1419_v60 }
 0x354   : > { %v2896_v59 = vpop.permute.xlu2 %1983 }
 0x355   : > { %v1985_v6 = vunpack.i.l.bf16 %v2896_v59  ;;  %v1986_v37 = vunpack.i.h.bf16 %v2896_v59  ;;  %v1703_v59 = vld [vmem:[%s2973_s4 + $0x10] sm:$0xff] }
 0x357   : > { %1620 = vxpose.xlu1.b32.cont [2/4] (short) (narrow) %v1600_v28, 32 }
 0x35c   : > { %v2892_v16 = vpop.permute.xlu1 %1466  ;;  %v1473_v33 = vpop.permute.xlu2 %1472 }
 0x35e   : > { %v2894_v3 = vpop.permute.xlu0 %1450 }
 0x35f   : > { %1621 = vxpose.xlu1.b32.cont [3/4] (short) (narrow) %v1609_v52, 32  ;;  %v2086_v52 = vmov 0  }
 0x360   : > { %2018 = vset.pattern.permute.xlu0 %v2086_v52  ;;  %2017 = vset.pattern.permute.xlu2 %v2086_v52 }
 0x361   : > { %1712 = vperm.xlu0 %2018, %v1702_v62   ;;  %1707 = vperm.xlu2 %2017, %v1701_v14  }
 0x364   : > { %v1435_v58 = vpop.permute.xlu1 %1434  ;;  %v1425_v50 = vpop.permute.xlu2 %1424 }
 0x365   : > { %v1520_v53 = vsel %vm1519_vm5, %v1515_v42, %v1435_v58 }
 0x366   : > { %v1457_v30 = vpop.permute.xlu0 %1456  ;;  %v1525_v28 = vsel %vm1524_vm6, %v1520_v53, %v2894_v3 }
 0x367   : > { %1622 = vxpose.xlu1.b32.end [4/4] (short) (narrow) %v1614_v18, 32  ;;  %v1530_v60 = vsel %vm1529_vm7, %v1525_v28, %v2892_v16 }
 0x369   : > { %1717 = vperm.xlu2 %2017, %v1703_v59  }
 0x36c   : > { %v1489_v48 = vpop.permute.xlu1 %1488  ;;  %v2009_v63 = vpop.permute.xlu2 %2008 }
 0x36d   : > { %v2010_v4 = vunpack.i.l.bf16 %v2009_v63  ;;  %v2011_v11 = vunpack.i.h.bf16 %v2009_v63 }
 0x36e   : > { %v1994_v35 = vpop.permute.xlu0 %1993 }
 0x36f   : > { %v1996_v40 = vunpack.i.h.bf16 %v1994_v35 }
 0x374   : > { %v1989_v27 = vpop.permute.xlu1 %1988  ;;  %v1483_v19 = vpop.permute.xlu2 %1482 }
 0x375   : > { %v1990_v57 = vunpack.i.l.bf16 %v1989_v27  ;;  %v1991_v15 = vunpack.i.h.bf16 %v1989_v27  ;;  %v1535_v24 = vsel %vm1534_vm8, %v1530_v60, %v1483_v19 }
 0x376   : > { %v1999_v34 = vpop.permute.xlu0 %1998 }
 0x377   : > { %v2000_v29 = vunpack.i.l.bf16 %v1999_v34  ;;  %v2001_v43 = vunpack.i.h.bf16 %v1999_v34 }
 0x37c   : > { %v1409_v25 = vpop.permute.xlu1 %1408 }
 0x37e   : > { %v2004_v55 = vpop.permute.xlu0 %2003 }
 0x37f   : > { %v2005_v23 = vunpack.i.l.bf16 %v2004_v55  ;;  %v2006_v31 = vunpack.i.h.bf16 %v2004_v55 }
 0x381   : > { %v1513_v21 = vsel %vm1510_vm4, %v2841_v20, %v2005_v23  ;;  %v1512_v56 = vsel %vm1510_vm4, %v2595_v26, %v2006_v31  ;;  %v1514_v20 = vsel %vm1510_vm4, %v2846_v22, %v1409_v25  ;;  %v1995_v26 = vunpack.i.l.bf16 %v1994_v35 }
 0x382   : > { %v1517_v38 = vsel %vm315_vm0, %v1513_v21, %v2010_v4  ;;  %v1516_v45 = vsel %vm315_vm0, %v1512_v56, %v2011_v11  ;;  %v1518_v54 = vsel %vm315_vm0, %v1514_v20, %v1425_v50  ;;  %vm1651_vm0 = vcmask 228352  }
 0x383   : > { %v1522_v46 = vsel %vm1519_vm5, %v1517_v38, %v1990_v57  ;;  %v1521_v51 = vsel %vm1519_vm5, %v1516_v45, %v1991_v15 }
 0x384   : > { %v1505_v0 = vpop.permute.xlu1 %1504 }
 0x386   : > { %v2014_v39 = vpop.permute.xlu0 %2013 }
 0x387   : > { %v2015_v17 = vunpack.i.l.bf16 %v2014_v39  ;;  %v2016_v47 = vunpack.i.h.bf16 %v2014_v39 }
 0x389   : > { %v1527_v8 = vsel %vm1524_vm6, %v1522_v46, %v2015_v17  ;;  %v1526_v41 = vsel %vm1524_vm6, %v1521_v51, %v2016_v47 }
 0x38a   : > { %v1532_v9 = vsel %vm1529_vm7, %v1527_v8, %v1995_v26  ;;  %v1531_v10 = vsel %vm1529_vm7, %v1526_v41, %v1996_v40 }
 0x38b   : > { %v1537_v7 = vsel %vm1534_vm8, %v1532_v9, %v2000_v29  ;;  %v1536_v2 = vsel %vm1534_vm8, %v1531_v10, %v2001_v43 }
 0x38c   : > { %v1441_v1 = vpop.permute.xlu1 %1440  ;;  %v1542_v32 = vsel %vm1539_vm10, %v1537_v7, %v1985_v6  ;;  %v1541_v13 = vsel %vm1539_vm10, %v1536_v2, %v1986_v37 }
 0x38d   : > { %v1523_v22 = vsel %vm1519_vm5, %v1518_v54, %v1441_v1 }
 0x38e   : > { %v1528_v5 = vsel %vm1524_vm6, %v1523_v22, %v1457_v30  ;;  %v1499_v36 = vpop.permute.xlu0 %1498  ;;  %v1704_v30 = vld [vmem:[%s2973_s4 + $0x18] sm:$0xf] }
 0x38f   : > { %v1533_v12 = vsel %vm1529_vm7, %v1528_v5, %v1473_v33  ;;  %v1540_v3 = vsel %vm1539_vm10, %v1535_v24, %v1499_v36  ;;  %1722 = vperm.xlu2 %2017, %v1704_v30  }
 0x390   : > { %v1538_v49 = vsel %vm1534_vm8, %v1533_v12, %v1489_v48 }
 0x391   : > { %v1543_v44 = vsel %vm1539_vm10, %v1538_v49, %v1505_v0 }
 0x392   : > { %1899 = vmatpush.msk.msrb.mxu2 %vm1664_vm9, %v1543_v44 }
 0x394   : > { %1681 = vmatpush.msrb.mxu2 %v1542_v32 }
 0x396   : > { %1682 = vmatpush.msrb.mxu2 %v1541_v13 }
 0x398   : > { %1683 = vmatpush.msrb.mxu2 %v1540_v3 }
 0x3bb   : > { %v1708_v18 = vpop.permute.xlu2 %1707 }
 0x3bc   : > { %1726 = vst.msk [vmem:[%s277_s14] sm:$0xff] %vm1725_vm11, %v1708_v18 }
 0x3c3   : > { %v1718_v35 = vpop.permute.xlu2 %1717  ;;  %v1731_v50 = vld [vmem:[%s277_s14] sm:$0xff] }
 0x3c4   : > { %1728 = vst.msk [vmem:[%s277_s14 + $0x10] sm:$0xff] %vm1725_vm11, %v1718_v35 }
 0x3cb   : > { %v1733_v4 = vld [vmem:[%s277_s14 + $0x10] sm:$0xff] }
 0x3d3   : > { %v1713_v27 = vpop.permute.xlu0 %1712 }
 0x3d4   : > { %1727 = vst.msk [vmem:[%s277_s14 + $0x8] sm:$0xff] %vm1725_vm11, %v1713_v27 }
 0x3db   : > { %v1732_v23 = vld [vmem:[%s277_s14 + $0x8] sm:$0xff] }
 0x3e9   : > { %v1723_v34 = vpop.permute.xlu2 %1722 }
 0x3ea   : > { %1730 = vst.msk [vmem:[%s277_s14 + $0x18] sm:$0xf] %vm1729_vm12, %v1723_v34 }
 0x3f1   : > { %v1734_v11 = vld [vmem:[%s277_s14 + $0x18] sm:$0xf] }
 0x3f3   : > { %v1635_v16 = vpop.trf.xlu1 }
 0x3f4   : > { %1900 = vmatmul.msk.f32.vlgmr.msrb.gmra.mxu2 %vm1651_vm0, %v1635_v16 }
 0x3fb   : > { %v1636_v58 = vpop.trf.xlu1 }
 0x3fc   : > { %1901 = vmatmul.msk.f32.gmra.mxu2 %vm1651_vm0, %v1636_v58 }
 0x403   : > { %v1637_v48 = vpop.trf.xlu1 }
 0x404   : > { %1902 = vmatmul.msk.f32.gmra.mxu2 %vm1651_vm0, %v1637_v48 }
 0x40b   : > { %v1638_v33 = vpop.trf.xlu1 }
 0x40c   : > { %1903 = vmatmul.msk.f32.gmra.mxu2 %vm1651_vm0, %v1638_v33 }
 0x477   : > { %v1685_v25 = vpop.f32.mrf.mxu2 }
 0x478   : > { %v1735_v55 = vadd.f32 %v1731_v50, %v1685_v25 }
 0x47a   : > { %1740 = vst.msk [vmem:[%s277_s14] sm:$0xff] %vm1725_vm11, %v1735_v55 }
 0x47f   : > { %v1688_v63 = vpop.f32.mrf.mxu2 }
 0x480   : > { %v1736_v31 = vadd.f32 %v1732_v23, %v1688_v63 }
 0x482   : > { %1741 = vst.msk [vmem:[%s277_s14 + $0x8] sm:$0xff] %vm1725_vm11, %v1736_v31 }
 0x487   : > { %v1691_v21 = vpop.f32.mrf.mxu2 }
 0x488   : > { %v1737_v0 = vadd.f32 %v1733_v4, %v1691_v21 }
 0x48a   : > { %1742 = vst.msk [vmem:[%s277_s14 + $0x10] sm:$0xff] %vm1725_vm11, %v1737_v0 }
 0x48f   : > { %v1694_v56 = vpop.f32.mrf.mxu2 }
 0x490   : > { %v1738_v38 = vadd.f32 %v1734_v11, %v1694_v56 }
 0x492   : > { %1744 = vst.msk [vmem:[%s277_s14 + $0x18] sm:$0xf] %vm1729_vm12, %v1738_v38 }
 0x493 PF: > { %s15_s20 = sadd.s32 1, %s2073_s20   ;;  %s2975_s18 = smov %s2069_s19 }
 0x494   : > { %p12_p5 = scmp.ge.s32.totalorder %s15_s20, 4   ;;  %s2976_s19 = smov %s2978_s21 }
 0x496   :  { %14 = sbr.rel (!%p12_p5) target bundleno = 2 (0x2), region = 84 }

</bundles_post_ra>
